<compile_context>
chip_gen: v7x
topology: tpu7x:2x2x1
jax: 0.10.0
libtpu: 0.0.40
codegen_flags: <defaults>
</compile_context>

<pallas_src>
import jax
import jax.numpy as jnp
from jax import lax
from jax.experimental import pallas as pl
from jax.experimental.pallas import tpu as pltpu


def _sa_layer_kernel(x_ref, wq_ref, wv_ref, bv_ref, wt_ref, bt_ref, o_ref):
    x = x_ref[0].astype(jnp.float32)                                     # (C, N)

    # Shared q/k 1x1-conv projection: k = Wq @ x  -> (C/R, N)
    k = jnp.dot(wq_ref[...], x, preferred_element_type=jnp.float32)

    # energy = x_q @ x_k = k^T k ; contract over the C/R axis (no explicit transpose).
    energy = lax.dot_general(
        k, k, dimension_numbers=(((0,), (0,)), ((), ())),
        preferred_element_type=jnp.float32)                              # (N, N)

    # Row softmax (dim=-1), numerically stable.
    m = jnp.max(energy, axis=-1, keepdims=True)
    p = jnp.exp(energy - m)
    attn = p / jnp.sum(p, axis=-1, keepdims=True)

    # Column re-normalization: attention / (1e-9 + attention.sum(dim=1)).
    attn = attn / (1e-9 + jnp.sum(attn, axis=0, keepdims=True))

    # Value projection (with bias) and attention mixing: x_r = x_v @ attention.
    xv = jnp.dot(wv_ref[...], x, preferred_element_type=jnp.float32) + bv_ref[...]
    xr = jnp.dot(xv, attn, preferred_element_type=jnp.float32)           # (C, N)

    # trans_conv + folded (inference) BatchNorm + ReLU on (x - x_r), then residual.
    d = x - xr
    t = jnp.dot(wt_ref[...], d, preferred_element_type=jnp.float32) + bt_ref[...]
    y = jnp.maximum(t, 0.0)
    o_ref[0] = (x + y).astype(o_ref.dtype)


def fold_sa_params(wq, wv, bv, wt, bt, bn_params, *, eps=1e-5):
    """One-time (hoisted) parameter folding: BN scale/bias folded into trans_conv."""
    gamma, beta, mean, var = bn_params
    scale = gamma / jnp.sqrt(var + eps)                                  # (C,)
    bias = beta - mean * scale                                           # (C,)
    wt_f = (wt * scale[:, None]).astype(jnp.float32)                     # (C, C)
    bt_f = (bt * scale + bias).reshape(-1, 1).astype(jnp.float32)        # (C, 1)
    return (
        wq.astype(jnp.float32),                 # (C/R, C)  shared q/k weight
        wv.astype(jnp.float32),                 # (C, C)
        bv.reshape(-1, 1).astype(jnp.float32),  # (C, 1)
        wt_f,
        bt_f,
    )


def sa_layer(x, folded_params):
    """x: (B, C, N) -> (B, C, N). Fused SA_Layer forward (eval-mode BN)."""
    wq, wv, bv, wt_f, bt_f = folded_params
    B, C, N = x.shape
    Cr = wq.shape[0]
    assert wq.shape == (Cr, C) and wv.shape == (C, C) and wt_f.shape == (C, C)
    assert C % 8 == 0 and N % 128 == 0, "C must be a multiple of 8, N of 128"

    return pl.pallas_call(
        _sa_layer_kernel,
        out_shape=jax.ShapeDtypeStruct((B, C, N), x.dtype),
        grid_spec=pltpu.PrefetchScalarGridSpec(
            num_scalar_prefetch=0,
            grid=(B,),
            in_specs=[
                pl.BlockSpec((1, C, N), lambda b: (b, 0, 0)),   # x, per-batch slab
                pl.BlockSpec((Cr, C), lambda b: (0, 0)),        # Wq (= Wk, shared)
                pl.BlockSpec((C, C), lambda b: (0, 0)),         # Wv
                pl.BlockSpec((C, 1), lambda b: (0, 0)),         # bv
                pl.BlockSpec((C, C), lambda b: (0, 0)),         # Wt (BN-scale folded)
                pl.BlockSpec((C, 1), lambda b: (0, 0)),         # bt (BN folded)
            ],
            out_specs=pl.BlockSpec((1, C, N), lambda b: (b, 0, 0)),
        ),
        compiler_params=pltpu.CompilerParams(
            dimension_semantics=("parallel",),   # v7x: batches shard across the 2 TCs
        ),
    )(x, wq, wv, bv, wt_f, bt_f)


def _reference(x, wq, wv, bv, wt, bt, bn_params, eps=1e-5):
    """Pure-JAX mirror of the PyTorch SA_Layer forward (eval-mode BatchNorm)."""
    xf = x.astype(jnp.float32)
    x_q = jnp.einsum('rc,bcn->bnr', wq, xf)                    # q_conv(x).permute(0,2,1)
    x_k = jnp.einsum('rc,bcn->brn', wq, xf)                    # k_conv(x)
    x_v = jnp.einsum('oc,bcn->bon', wv, xf) + bv[None, :, None]
    energy = jnp.einsum('bnr,brm->bnm', x_q, x_k)              # (B, N, N)
    attn = jax.nn.softmax(energy, axis=-1)
    attn = attn / (1e-9 + jnp.sum(attn, axis=1, keepdims=True))
    x_r = jnp.einsum('bcn,bnm->bcm', x_v, attn)
    d = xf - x_r
    t = jnp.einsum('oc,bcn->bon', wt, d) + bt[None, :, None]
    gamma, beta, mean, var = bn_params
    t = (t - mean[None, :, None]) / jnp.sqrt(var[None, :, None] + eps) \
        * gamma[None, :, None] + beta[None, :, None]
    y = jnp.maximum(t, 0.0)
    return (xf + y).astype(x.dtype)


if __name__ == "__main__":
    key = jax.random.PRNGKey(0)
    B, C, N, R = 2, 128, 128, 4      # channels=128, R=4 -> C/R = 32 ; N points
    Cr = C // R

    ks = jax.random.split(key, 10)
    x = jax.random.normal(ks[0], (B, C, N), dtype=jnp.float32)

    # Conv1d(kernel_size=1) weights stored as (C_out, C_in); biases as (C,).
    wq = 0.1 * jax.random.normal(ks[1], (Cr, C), dtype=jnp.float32)   # q_conv == k_conv
    wv = 0.1 * jax.random.normal(ks[2], (C, C), dtype=jnp.float32)
    bv = 0.1 * jax.random.normal(ks[3], (C,), dtype=jnp.float32)
    wt = 0.1 * jax.random.normal(ks[4], (C, C), dtype=jnp.float32)
    bt = 0.1 * jax.random.normal(ks[5], (C,), dtype=jnp.float32)
    # BatchNorm1d (eval mode): gamma, beta, running_mean, running_var.
    bn_params = (
        1.0 + 0.1 * jax.random.normal(ks[6], (C,), dtype=jnp.float32),
        0.1 * jax.random.normal(ks[7], (C,), dtype=jnp.float32),
        0.05 * jax.random.normal(ks[8], (C,), dtype=jnp.float32),
        1.0 + 0.1 * jax.random.uniform(ks[9], (C,), dtype=jnp.float32),
    )

    folded = fold_sa_params(wq, wv, bv, wt, bt, bn_params)   # hoisted, once per param set
    out = jax.block_until_ready(sa_layer(x, folded))

    ref = _reference(x, wq, wv, bv, wt, bt, bn_params)
    assert out.shape == (B, C, N), out.shape
    max_err = float(jnp.max(jnp.abs(out - ref)))
    assert jnp.allclose(out, ref, atol=1e-3, rtol=1e-3), f"mismatch vs reference: {max_err}"

    print("KERNEL_OK")
</pallas_src>

<mosaic_0001>
module attributes {stable_mosaic.version = 11 : i64} {
  func.func @_sa_layer_kernel(%arg0: i32, %arg1: memref<1x128x128xf32, #tpu.memory_space<vmem>>, %arg2: memref<32x128xf32, #tpu.memory_space<vmem>>, %arg3: memref<128x128xf32, #tpu.memory_space<vmem>>, %arg4: memref<128x1xf32, #tpu.memory_space<vmem>>, %arg5: memref<128x128xf32, #tpu.memory_space<vmem>>, %arg6: memref<128x1xf32, #tpu.memory_space<vmem>>, %arg7: memref<1x128x128xf32, #tpu.memory_space<vmem>>) attributes {dimension_semantics = [#tpu.dimension_semantics<parallel>], iteration_bounds = array<i64: 2>, scalar_prefetch = 0 : i64, scratch_operands = 0 : i64, tpu.core_type = #tpu.core_type<tc>, window_params = [{transform_indices = @transform_0, window_bounds = array<i64: 1, 128, 128>}, {pipeline_mode = #tpu.pipeline_mode<synchronous>, transform_indices = @transform_1, window_bounds = array<i64: 32, 128>}, {pipeline_mode = #tpu.pipeline_mode<synchronous>, transform_indices = @transform_2, window_bounds = array<i64: 128, 128>}, {pipeline_mode = #tpu.pipeline_mode<synchronous>, transform_indices = @transform_3, window_bounds = array<i64: 128, 1>}, {pipeline_mode = #tpu.pipeline_mode<synchronous>, transform_indices = @transform_4, window_bounds = array<i64: 128, 128>}, {pipeline_mode = #tpu.pipeline_mode<synchronous>, transform_indices = @transform_5, window_bounds = array<i64: 128, 1>}, {transform_indices = @transform_6, window_bounds = array<i64: 1, 128, 128>}]} {
    %c0 = arith.constant 0 : index
    %c0_0 = arith.constant 0 : index
    %c0_1 = arith.constant 0 : index
    %0 = vector.load %arg1[%c0, %c0_0, %c0_1] : memref<1x128x128xf32, #tpu.memory_space<vmem>>, vector<1x128x128xf32>
    %1 = vector.shape_cast %0 : vector<1x128x128xf32> to vector<128x128xf32>
    %c0_2 = arith.constant 0 : index
    %c0_3 = arith.constant 0 : index
    %2 = vector.load %arg2[%c0_2, %c0_3] : memref<32x128xf32, #tpu.memory_space<vmem>>, vector<32x128xf32>
    %cst = arith.constant dense<0.000000e+00> : vector<32x128xf32>
    %3 = tpu.matmul %2, %1, %cst {dimension_numbers = #tpu.dot_dimension_numbers<[1], [0], [0], [1], [0, 0, 1, 1], [], []>} : vector<32x128xf32>, vector<128x128xf32>, vector<32x128xf32> -> vector<32x128xf32>
    %cst_4 = arith.constant dense<0.000000e+00> : vector<128x128xf32>
    %4 = tpu.matmul %3, %3, %cst_4 {dimension_numbers = #tpu.dot_dimension_numbers<[0], [0], [1], [1], [0, 1, 1, 1], [], []>} : vector<32x128xf32>, vector<32x128xf32>, vector<128x128xf32> -> vector<128x128xf32>
    %cst_5 = arith.constant dense<0xFF800000> : vector<128xf32>
    %5 = vector.multi_reduction <maximumf>, %4, %cst_5 [1] : vector<128x128xf32> to vector<128xf32>
    %6 = vector.shape_cast %5 : vector<128xf32> to vector<128x1xf32>
    %7 = vector.broadcast %6 : vector<128x1xf32> to vector<128x128xf32>
    %8 = arith.subf %4, %7 : vector<128x128xf32>
    %9 = math.exp %8 : vector<128x128xf32>
    %cst_6 = arith.constant dense<0.000000e+00> : vector<128xf32>
    %10 = vector.multi_reduction <add>, %9, %cst_6 [1] : vector<128x128xf32> to vector<128xf32>
    %11 = vector.shape_cast %10 : vector<128xf32> to vector<128x1xf32>
    %12 = vector.broadcast %11 : vector<128x1xf32> to vector<128x128xf32>
    %13 = arith.divf %9, %12 : vector<128x128xf32>
    %cst_7 = arith.constant dense<0.000000e+00> : vector<128xf32>
    %14 = vector.multi_reduction <add>, %13, %cst_7 [0] : vector<128x128xf32> to vector<128xf32>
    %15 = vector.shape_cast %14 : vector<128xf32> to vector<1x128xf32>
    %cst_8 = arith.constant 9.99999971E-10 : f32
    %16 = vector.broadcast %cst_8 : f32 to vector<1x128xf32>
    %17 = arith.addf %16, %15 : vector<1x128xf32>
    %18 = vector.broadcast %17 : vector<1x128xf32> to vector<128x128xf32>
    %19 = arith.divf %13, %18 : vector<128x128xf32>
    %c0_9 = arith.constant 0 : index
    %c0_10 = arith.constant 0 : index
    %20 = vector.load %arg3[%c0_9, %c0_10] : memref<128x128xf32, #tpu.memory_space<vmem>>, vector<128x128xf32>
    %cst_11 = arith.constant dense<0.000000e+00> : vector<128x128xf32>
    %21 = tpu.matmul %20, %1, %cst_11 {dimension_numbers = #tpu.dot_dimension_numbers<[1], [0], [0], [1], [0, 0, 1, 1], [], []>} : vector<128x128xf32>, vector<128x128xf32>, vector<128x128xf32> -> vector<128x128xf32>
    %c0_12 = arith.constant 0 : index
    %c0_13 = arith.constant 0 : index
    %22 = vector.load %arg4[%c0_12, %c0_13] : memref<128x1xf32, #tpu.memory_space<vmem>>, vector<128x1xf32>
    %23 = vector.broadcast %22 : vector<128x1xf32> to vector<128x128xf32>
    %24 = arith.addf %21, %23 : vector<128x128xf32>
    %cst_14 = arith.constant dense<0.000000e+00> : vector<128x128xf32>
    %25 = tpu.matmul %24, %19, %cst_14 {dimension_numbers = #tpu.dot_dimension_numbers<[1], [0], [0], [1], [0, 0, 1, 1], [], []>} : vector<128x128xf32>, vector<128x128xf32>, vector<128x128xf32> -> vector<128x128xf32>
    %26 = arith.subf %1, %25 : vector<128x128xf32>
    %c0_15 = arith.constant 0 : index
    %c0_16 = arith.constant 0 : index
    %27 = vector.load %arg5[%c0_15, %c0_16] : memref<128x128xf32, #tpu.memory_space<vmem>>, vector<128x128xf32>
    %cst_17 = arith.constant dense<0.000000e+00> : vector<128x128xf32>
    %28 = tpu.matmul %27, %26, %cst_17 {dimension_numbers = #tpu.dot_dimension_numbers<[1], [0], [0], [1], [0, 0, 1, 1], [], []>} : vector<128x128xf32>, vector<128x128xf32>, vector<128x128xf32> -> vector<128x128xf32>
    %c0_18 = arith.constant 0 : index
    %c0_19 = arith.constant 0 : index
    %29 = vector.load %arg6[%c0_18, %c0_19] : memref<128x1xf32, #tpu.memory_space<vmem>>, vector<128x1xf32>
    %30 = vector.broadcast %29 : vector<128x1xf32> to vector<128x128xf32>
    %31 = arith.addf %28, %30 : vector<128x128xf32>
    %cst_20 = arith.constant 0.000000e+00 : f32
    %32 = vector.broadcast %cst_20 : f32 to vector<128x128xf32>
    %33 = arith.maximumf %31, %32 : vector<128x128xf32>
    %34 = arith.addf %1, %33 : vector<128x128xf32>
    %c0_21 = arith.constant 0 : index
    %c0_22 = arith.constant 0 : index
    %c0_23 = arith.constant 0 : index
    %35 = vector.load %arg7[%c0_21, %c0_22, %c0_23] : memref<1x128x128xf32, #tpu.memory_space<vmem>>, vector<1x128x128xf32>
    %36 = vector.shape_cast %35 : vector<1x128x128xf32> to vector<128x128xf32>
    %37 = vector.shape_cast %34 : vector<128x128xf32> to vector<1x128x128xf32>
    tpu.vector_store %arg7[%c0_21, %c0_22, %c0_23], %37 {strides = array<i32>} : memref<1x128x128xf32, #tpu.memory_space<vmem>>, vector<1x128x128xf32>,
    return
  }
  func.func @transform_0(%arg0: i32) -> (i32, i32, i32) {
    %c0_i32 = arith.constant 0 : i32
    %c0_i32_0 = arith.constant 0 : i32
    %c0_i32_1 = arith.constant 0 : i32
    return %arg0, %c0_i32, %c0_i32_0 : i32, i32, i32
  }
  func.func @transform_1(%arg0: i32) -> (i32, i32) {
    %c0_i32 = arith.constant 0 : i32
    %c0_i32_0 = arith.constant 0 : i32
    %c0_i32_1 = arith.constant 0 : i32
    return %c0_i32, %c0_i32_0 : i32, i32
  }
  func.func @transform_2(%arg0: i32) -> (i32, i32) {
    %c0_i32 = arith.constant 0 : i32
    %c0_i32_0 = arith.constant 0 : i32
    %c0_i32_1 = arith.constant 0 : i32
    return %c0_i32, %c0_i32_0 : i32, i32
  }
  func.func @transform_3(%arg0: i32) -> (i32, i32) {
    %c0_i32 = arith.constant 0 : i32
    %c0_i32_0 = arith.constant 0 : i32
    %c0_i32_1 = arith.constant 0 : i32
    return %c0_i32, %c0_i32_0 : i32, i32
  }
  func.func @transform_4(%arg0: i32) -> (i32, i32) {
    %c0_i32 = arith.constant 0 : i32
    %c0_i32_0 = arith.constant 0 : i32
    %c0_i32_1 = arith.constant 0 : i32
    return %c0_i32, %c0_i32_0 : i32, i32
  }
  func.func @transform_5(%arg0: i32) -> (i32, i32) {
    %c0_i32 = arith.constant 0 : i32
    %c0_i32_0 = arith.constant 0 : i32
    %c0_i32_1 = arith.constant 0 : i32
    return %c0_i32, %c0_i32_0 : i32, i32
  }
  func.func @transform_6(%arg0: i32) -> (i32, i32, i32) {
    %c0_i32 = arith.constant 0 : i32
    %c0_i32_0 = arith.constant 0 : i32
    %c0_i32_1 = arith.constant 0 : i32
    return %arg0, %c0_i32, %c0_i32_0 : i32, i32, i32
  }
}

</mosaic_0001>

<bundles_post_ra>
// kernel: tpu_custom_call.1
= control target key start
LH: loop header
LB: loop body
LE: loop exit
PB: predicated region body
PF: predicated region fallthrough
CT: control target
= control target key end

     0   :  { %11 = vsyncpa [#allocation3], 0  ;;  %s3231_s0 = inlined_call_operand.vmem [shape: f32[2,128,128], index: 0, kind: input, shape index: {}]   ;;  %s3232_s1 = inlined_call_operand.hbm [shape: f32[32,128], index: 1, kind: input, shape index: {}]   ;;  %s3233_s2 = inlined_call_operand.hbm [shape: f32[128,128], index: 2, kind: input, shape index: {}]   ;;  %s3234_s3 = inlined_call_operand.vmem [shape: f32[128,1], index: 3, kind: input, shape index: {}]   ;;  %s3235_s4 = inlined_call_operand.hbm [shape: f32[128,128], index: 4, kind: input, shape index: {}]   ;;  %s3236_s5 = inlined_call_operand.vmem [shape: f32[128,1], index: 5, kind: input, shape index: {}]   ;;  %s3237_s6 = inlined_call_operand.hbm [shape: f32[2,128,128], index: 6, kind: output, shape index: {}]  }
   0x1   :  { %12 = vsyncpa [#allocation6], 0 }
   0x2   :  { %13 = vsyncpa [#allocation4], 0 }
   0x3   :  { %15 = vsyncpa [#allocation4 + $0x1], 0  ;;  %s2560_s21 = smov 0   ;;  %s2562_s22 = smov 0  }
   0x4   :  { %s2564_s23 = smov 0   ;;  %s2566_s24 = smov 0  }
   0x5 LB: > { %3242 = sst [smem:[#allocation12_spill]] %s2510_s23  ;;  %s2581_s25 = sadd.s32 4294967295, %s2514_s24   ;;  %s2514_s24 = sphi %s2566_s24, %s3260_s24   ;;  %s2510_s23 = sphi %s2564_s23, %s3257_s23   ;;  %s2506_s22 = sphi %s2562_s22, %s3259_s22   ;;  %s2502_s21 = sphi %s2560_s21, %s3258_s21  }
   0x6   : > { %s1638_s26 = sadd.s32 4294967294, %s2514_s24   ;;  %s2585_s27 = sadd.s32 1, %s2514_s24  }
   0x7   : > { %s159_s28 = sadd.s32 1, %s2510_s23  ;;  %s156_s29 = ssub.s32 %s2514_s24, %s2585_s27 }
   0x8   : > { %p169_p0 = scmp.ne.s32.totalorder %s2510_s23, %s2506_s22  ;;  %p157_p1 = scmp.eq.s32.totalorder %s156_s29, 0 }
   0x9   : > { %p170_p2 = scmp.eq.s32.totalorder %s2581_s25, 1  ;;  %p175_p3 = scmp.ne.s32.totalorder %s2506_s22, %s2502_s21 }
   0xa   : > { %p176_p4 = scmp.eq.s32.totalorder %s1638_s26, 1  ;;  %p1639_p7 = scmp.ge.s32.totalorder %s2514_s24, 1 }
   0xb   : > { %s2596_s30 = scalar_select %p157_p1, %s2510_s23, %s159_s28  }
   0xc   : > { %p2598_p5 = por %p170_p2, %p169_p0  ;;  %p2602_p6 = por %p176_p4, %p175_p3 }
   0xd   : > { %3243 = sst [smem:[#allocation13_spill]] %s2596_s30  ;;  %p183_p8 = scmp.lt.s32.totalorder %s2514_s24, 3 }
   0xe   : > { %s3244_s7 = scalar_select %p2598_p5, 1, 0 }
   0xf   : > { %s3245_s8 = scalar_select %p2602_p6, 1, 0 }
  0x10   : > { %p3238_p9 = scmp.eq.s32.totalorder %s2581_s25, 0  ;;  %p2609_p10 = pnand %p1639_p7, %p183_p8 }
  0x11   : > { %s2516_s10 = smov [#allocation5]   ;;  %s2517_s13 = smov [#allocation2]  }
  0x12   : > { %s3246_s9 = scalar_select %p2609_p10, 1, 0 }
  0x13   : > { %p2214_p11 = pneg %p2609_p10  ;;  %s208_s11 = sshll.u32 %s2516_s10, 4  ;;  %s2615_s11 = int_to_ptr.vmem [resolvable:$true] %s208_s11 }
  0x14   : > { %s195_s14 = sshll.u32 %s2517_s13, 4  ;;  %s2518_s15 = smov [#allocation7]   ;;  %s2623_s14 = int_to_ptr.vmem [resolvable:$true] %s195_s14 }
  0x15   : > { %p2619_p12 = pnand %p3238_p9, %p2214_p11  ;;  %s2625_s16 = sshll.u32 %s2518_s15, 4  ;;  %s225_s16 = int_to_ptr.vmem [resolvable:$true] %s2625_s16 }
  0x16   : > { %s2360_s19 = scalar_lea.hbm %s3233_s2, 2048 }
  0x17   : > { %p2361_p13 = scmp.ne.s32.totalorder %s3233_s2, %s2360_s19  ;;  %p2635_p0 = pneg %p2619_p12 }
  0x18   : > { %p2367_p3 = scmp.lt.u32.totalorder %s2360_s19, %s3233_s2 }
  0x19   : > { %p2363_p1 = pnand %p2635_p0, %p2361_p13 }
  0x1b   : > { %p2364_p2 = pneg %p2363_p1 }
  0x1d   : > { %p2369_p4 = pnand %p2367_p3, %p2364_p2 }
  0x1f   : > { %2372 = shalt.err (!%p2369_p4)
}
  0x20   : > { %s2373_s13 = scalar_lea.vmem %s2615_s11, 2048  ;;  %p2381_p9 = scmp.lt.s32.totalorder %s2615_s11, %s2615_s11 }
  0x21   : > { %p2374_p7 = scmp.ne.s32.totalorder %s2615_s11, %s2373_s13  ;;  %p2382_p6 = scmp.lt.s32.totalorder %s2373_s13, %s2373_s13 }
  0x23   : > { %p2376_p8 = pnand %p2374_p7, %p2635_p0  ;;  %p2383_p13 = por %p2382_p6, %p2381_p9 }
  0x25   : > { %p2377_p11 = pneg %p2376_p8 }
  0x27   : > { %p2384_p1 = pnand %p2383_p13, %p2377_p11 }
  0x29   : > { %2387 = shalt.err (!%p2384_p1)
}
  0x2a   : > { %s2519_s15 = smov 128   ;;  %s2520_s17 = smov 8  }
  0x2b   : > { %2220 = dma.hbm_to_vmem [thread:$0]  (!%p2619_p12), %s3233_s2, 2048, %s2615_s11, [#allocation6], %s2519_s15, %s2519_s15, %s2520_s17  }
  0x2c   : > { %s2388_s29 = scalar_lea.hbm %s3232_s1, 512 }
  0x2d   : > { %p2389_p6 = scmp.ne.s32.totalorder %s3232_s1, %s2388_s29  ;;  %p2395_p3 = scmp.lt.u32.totalorder %s2388_s29, %s3232_s1 }
  0x2f   : > { %p2391_p9 = pnand %p2389_p6, %p2635_p0 }
  0x31   : > { %p2392_p2 = pneg %p2391_p9 }
  0x33   : > { %p2397_p4 = pnand %p2395_p3, %p2392_p2 }
  0x35   : > { %2400 = shalt.err (!%p2397_p4)
}
  0x36   : > { %s2401_s11 = scalar_lea.vmem %s2623_s14, 512  ;;  %p2409_p13 = scmp.lt.s32.totalorder %s2623_s14, %s2623_s14 }
  0x37   : > { %p2402_p7 = scmp.ne.s32.totalorder %s2623_s14, %s2401_s11  ;;  %p2410_p1 = scmp.lt.s32.totalorder %s2401_s11, %s2401_s11 }
  0x39   : > { %p2404_p8 = pnand %p2402_p7, %p2635_p0  ;;  %p2411_p6 = por %p2410_p1, %p2409_p13 }
  0x3b   : > { %p2405_p11 = pneg %p2404_p8 }
  0x3d   : > { %p2412_p9 = pnand %p2411_p6, %p2405_p11 }
  0x3f   : > { %2415 = shalt.err (!%p2412_p9)
}
  0x40   : > { %2217 = dma.hbm_to_vmem [thread:$0]  (!%p2619_p12), %s3232_s1, 512, %s2623_s14, [#allocation3], %s2519_s15, %s2519_s15, %s2520_s17  }
  0x41   : > { %s2416_s20 = scalar_lea.hbm %s3235_s4, 2048 }
  0x42   : > { %p2417_p2 = scmp.ne.s32.totalorder %s3235_s4, %s2416_s20  ;;  %p2423_p7 = scmp.lt.u32.totalorder %s2416_s20, %s3235_s4 }
  0x44   : > { %p2419_p3 = pnand %p2417_p2, %p2635_p0 }
  0x46   : > { %p2420_p4 = pneg %p2419_p3 }
  0x48   : > { %p2425_p8 = pnand %p2423_p7, %p2420_p4 }
  0x4a   : > { %2428 = shalt.err (!%p2425_p8)
}
  0x4b   : > { %s2429_s11 = scalar_lea.vmem %s225_s16, 2048  ;;  %p2437_p6 = scmp.lt.s32.totalorder %s225_s16, %s225_s16 }
  0x4c   : > { %p2430_p11 = scmp.ne.s32.totalorder %s225_s16, %s2429_s11  ;;  %p2438_p9 = scmp.lt.s32.totalorder %s2429_s11, %s2429_s11 }
  0x4e   : > { %p2432_p13 = pnand %p2430_p11, %p2635_p0  ;;  %p2439_p5 = por %p2438_p9, %p2437_p6 }
  0x50   : > { %p2433_p1 = pneg %p2432_p13 }
  0x52   : > { %p2440_p10 = pnand %p2439_p5, %p2433_p1 }
  0x54   : > { %2443 = shalt.err (!%p2440_p10)
}
  0x55   : > { %2223 = dma.hbm_to_vmem [thread:$0]  (!%p2619_p12), %s3235_s4, 2048, %s225_s16, [#allocation6], %s2519_s15, %s2519_s15, %s2520_s17  }
  0x56   : > { %p3249_p2 = scmp.ne.s32.totalorder %s3246_s9, 0 }
  0x57   : > { %p3250_p0 = scmp.eq.s32.totalorder (!%p3249_p2), %s2581_s25, 0 }
  0x58   : > { %251 = sbr.rel (%p3249_p2) target bundleno = 1641 (0x669), region = 44 }
  0x5f   : > { %2489 = dma.done.wait (%p3250_p0), [#allocation3], 512   ;;  %p3251_p3 = pmov %p3250_p0 }
  0x60   : > { %p3252_p5 = pmov %p3250_p0 }
  0x61   : > { %2491 = vsyncadd (%p3251_p3), [#allocation3], 4294966784 }
  0x62   : > { %2493 = dma.done.wait (%p3252_p5), [#allocation6], 4096   ;;  %p3253_p10 = pmov %p3250_p0 }
  0x63   : > { %p289_p4 = scmp.lt.s32.totalorder %s2581_s25, 1  ;;  %v310_v9 = vld [vmem:[#allocation2] sm:$0xff]  ;;  %v311_v25 = vld [vmem:[#allocation2 + $0x8] sm:$0xff]  ;;  %v312_v26 = vld [vmem:[#allocation2 + $0x10] sm:$0xff]  ;;  %vm431_vm0 = vcmask 261120   ;;  %s1673_s18 = sshll.u32 %s2581_s25, 11 }
  0x64   : > { %2495 = vsyncadd (%p3253_p10), [#allocation6], 4294963200  ;;  %1842 = vmatprep.mubr.f32.mxu0 %v310_v9  ;;  %v313_v27 = vld [vmem:[#allocation2 + $0x18] sm:$0xff]  ;;  %s3181_s29 = scalar_lea.hbm %s3237_s6, %s1673_s18  ;;  %p3254_p7 = scmp.ne.s32.totalorder %s3244_s7, 0 }
  0x65   : > { %s290_s12 = scalar_select %p289_p4, %s2581_s25, 1  ;;  %v815_v9 = vld [vmem:[#allocation5 + $0x38] sm:$0xff] }
  0x66   : > { %s2522_s13 = smov [#allocation8]  }
  0x67   : > { %s1672_s16 = sshll.u32 %s290_s12, 7  ;;  %s2448_s11 = sshll.u32 %s2522_s13, 4  ;;  %s2449_s11 = int_to_ptr.vmem [resolvable:$false] %s2448_s11 }
  0x68   : > { %s2722_s15 = scalar_lea.vmem %s3231_s0, %s1672_s16  ;;  %s2450_s14 = scalar_lea.vmem %s2449_s11, 4096 }
  0x69   : > { %v294_v0 = vld [vmem:[%s2722_s15] sm:$0xff]  ;;  %v295_v1 = vld [vmem:[%s2722_s15 + $0x8] sm:$0xff]  ;;  %v296_v2 = vld [vmem:[%s2722_s15 + $0x10] sm:$0xff] }
  0x6a   : > { %v2727_v3 = vpack.c.bf16 %v295_v1, %v294_v0  ;;  %v297_v4 = vld [vmem:[%s2722_s15 + $0x18] sm:$0xff]  ;;  %v298_v6 = vld [vmem:[%s2722_s15 + $0x20] sm:$0xff]  ;;  %v299_v7 = vld [vmem:[%s2722_s15 + $0x28] sm:$0xff] }
  0x6b   : > { %v2730_v5 = vpack.c.bf16 %v297_v4, %v296_v2  ;;  %v2737_v8 = vpack.c.bf16 %v299_v7, %v298_v6  ;;  %v300_v10 = vld [vmem:[%s2722_s15 + $0x30] sm:$0xff]  ;;  %v301_v11 = vld [vmem:[%s2722_s15 + $0x38] sm:$0xff]  ;;  %v302_v13 = vld [vmem:[%s2722_s15 + $0x40] sm:$0xff] }
  0x6c   : > { %2049 = vmatprep.subr.bf16.mxu0 %v2727_v3  ;;  %v2060_v12 = vpack.c.bf16 %v301_v11, %v300_v10  ;;  %v303_v14 = vld [vmem:[%s2722_s15 + $0x48] sm:$0xff]  ;;  %v304_v16 = vld [vmem:[%s2722_s15 + $0x50] sm:$0xff]  ;;  %v305_v17 = vld [vmem:[%s2722_s15 + $0x58] sm:$0xff] }
  0x6d   : > { %2051 = vmatpush3.bf16.msra.mxu0 %v2727_v3  ;;  %v2064_v15 = vpack.c.bf16 %v303_v14, %v302_v13  ;;  %v2068_v18 = vpack.c.bf16 %v305_v17, %v304_v16  ;;  %v306_v19 = vld [vmem:[%s2722_s15 + $0x60] sm:$0xff]  ;;  %v307_v20 = vld [vmem:[%s2722_s15 + $0x68] sm:$0xff]  ;;  %v308_v22 = vld [vmem:[%s2722_s15 + $0x70] sm:$0xff] }
  0x6e   : > { %2053 = vmatprep.subr.bf16.mxu0 %v2730_v5  ;;  %v2072_v21 = vpack.c.bf16 %v307_v20, %v306_v19  ;;  %v309_v23 = vld [vmem:[%s2722_s15 + $0x78] sm:$0xff]  ;;  %v808_v0 = vld [vmem:[#allocation5] sm:$0xff]  ;;  %v809_v1 = vld [vmem:[#allocation5 + $0x8] sm:$0xff] }
  0x6f   : > { %v2076_v24 = vpack.c.bf16 %v309_v23, %v308_v22  ;;  %v810_v2 = vld [vmem:[#allocation5 + $0x10] sm:$0xff]  ;;  %v811_v4 = vld [vmem:[#allocation5 + $0x18] sm:$0xff]  ;;  %v812_v6 = vld [vmem:[#allocation5 + $0x20] sm:$0xff] }
  0x70   : > { %v813_v7 = vld [vmem:[#allocation5 + $0x28] sm:$0xff]  ;;  %v816_v10 = vld [vmem:[#allocation5 + $0x40] sm:$0xff]  ;;  %v819_v13 = vld [vmem:[#allocation5 + $0x58] sm:$0xff] }
  0x71   : > { %2055 = vmatpush3.bf16.msra.mxu0 %v2730_v5  ;;  %v817_v11 = vld [vmem:[#allocation5 + $0x48] sm:$0xff]  ;;  %v820_v14 = vld [vmem:[#allocation5 + $0x60] sm:$0xff]  ;;  %v822_v16 = vld [vmem:[#allocation5 + $0x70] sm:$0xff] }
  0x72   : > { %2057 = vmatprep.subr.bf16.mxu0 %v2737_v8  ;;  %v823_v17 = vld [vmem:[#allocation5 + $0x78] sm:$0xff] }
  0x75   : > { %2059 = vmatpush3.bf16.msra.mxu0 %v2737_v8 }
  0x76   : > { %2061 = vmatprep.subr.bf16.mxu0 %v2060_v12 }
  0x79   : > { %2063 = vmatpush3.bf16.msra.mxu0 %v2060_v12 }
  0x7a   : > { %2065 = vmatprep.subr.bf16.mxu0 %v2064_v15 }
  0x7d   : > { %2067 = vmatpush3.bf16.msra.mxu0 %v2064_v15 }
  0x7e   : > { %2069 = vmatprep.subr.bf16.mxu0 %v2068_v18 }
  0x81   : > { %2071 = vmatpush3.bf16.msra.mxu0 %v2068_v18 }
  0x82   : > { %2073 = vmatprep.subr.bf16.mxu0 %v2072_v21 }
  0x85   : > { %2075 = vmatpush3.bf16.msra.mxu0 %v2072_v21 }
  0x86   : > { %2077 = vmatprep.subr.bf16.mxu0 %v2076_v24 }
  0x89   : > { %2079 = vmatpush3.bf16.msra.mxu0 %v2076_v24 }
  0x8c   : > { %1843 = vmatmul.mubr.f32.vlgmr.msra.gmra.mrb[0].mxu0 %v311_v25 }
  0x8d   : > { %1845 = vmatprep.mubr.f32.mxu0 %v312_v26 }
  0x90   : > { %1846 = vmatmul.mubr.f32.gmra.mrb[2].mxu0 %v313_v27 }
 0x15f   : > { %v1844_v28 = vpop.f32.mrb[0].mxu0 }
 0x160   : > { %v380_v29 = vpop.f32.mrb[1].mxu0 }
 0x161   : > { %399 = vxpose.xlu0.b32.start [1/4] (short) %v380_v29, 128  ;;  %v2080_v30 = vpack.c.bf16 %v1844_v28, %v380_v29 }
 0x163   : > { %2081 = vmatprep.subr.bf16.mxu1 %v2080_v30  ;;  %v1847_v31 = vpop.f32.mrb[2].mxu0 }
 0x164   : > { %2083 = vmatpush3.bf16.msra.mxu1 %v2080_v30  ;;  %v390_v32 = vpop.f32.mrb[3].mxu0 }
 0x165   : > { %400 = vxpose.xlu0.b32.cont [2/4] (short) %v1844_v28, 128  ;;  %v2084_v33 = vpack.c.bf16 %v1847_v31, %v390_v32 }
 0x167   : > { %2085 = vmatprep.subr.bf16.mxu1 %v2084_v33 }
 0x168   : > { %2087 = vmatpush3.bf16.msra.mxu1 %v2084_v33 }
 0x169   : > { %401 = vxpose.xlu0.b32.cont [3/4] (short) %v390_v32, 128  ;;  %2089 = vmatprep.subr.bf16.mxu1 %v2727_v3 }
 0x16d   : > { %402 = vxpose.xlu0.b32.end [4/4] (short) %v1847_v31, 128 }
 0x1e1   : > { %v415_v34 = vpop.trf.xlu0 }
 0x1e2   : > { %1856 = vmatprep.mubr.msk.f32.mxu1 %vm431_vm0, %v415_v34 }
 0x1e5   : > { %v416_v35 = vpop.trf.xlu0 }
 0x1e6   : > { %1857 = vmatmul.mubr.msk.f32.vlgmr.msra.gmra.mrb[0].mxu1 %vm431_vm0, %v416_v35 }
 0x1e7   : > { %2091 = vmatpush3.bf16.msra.mxu1 %v2727_v3 }
 0x1e8   : > { %2093 = vmatprep.subr.bf16.mxu1 %v2730_v5 }
 0x1e9   : > { %v417_v36 = vpop.trf.xlu0 }
 0x1ea   : > { %1859 = vmatprep.mubr.msk.f32.mxu1 %vm431_vm0, %v417_v36 }
 0x1eb   : > { %2095 = vmatpush3.bf16.msra.mxu1 %v2730_v5 }
 0x1ec   : > { %2097 = vmatprep.subr.bf16.mxu1 %v2737_v8 }
 0x1ed   : > { %v418_v37 = vpop.trf.xlu0 }
 0x1ee   : > { %1860 = vmatmul.mubr.msk.f32.gmra.mrb[2].mxu1 %vm431_vm0, %v418_v37 }
 0x1ef   : > { %2099 = vmatpush3.bf16.msra.mxu1 %v2737_v8  ;;  %v814_v8 = vld [vmem:[#allocation5 + $0x30] sm:$0xff] }
 0x1f0   : > { %2101 = vmatprep.subr.bf16.mxu1 %v2060_v12 }
 0x1f1   : > { %v419_v38 = vpop.trf.xlu0 }
 0x1f2   : > { %1862 = vmatprep.mubr.msk.f32.mxu1 %vm431_vm0, %v419_v38 }
 0x1f3   : > { %2103 = vmatpush3.bf16.msra.mxu1 %v2060_v12  ;;  %v818_v12 = vld [vmem:[#allocation5 + $0x50] sm:$0xff] }
 0x1f4   : > { %2105 = vmatprep.subr.bf16.mxu1 %v2064_v15 }
 0x1f5   : > { %v420_v39 = vpop.trf.xlu0 }
 0x1f6   : > { %1863 = vmatmul.mubr.msk.f32.gmra.mrb[4].mxu1 %vm431_vm0, %v420_v39 }
 0x1f7   : > { %2107 = vmatpush3.bf16.msra.mxu1 %v2064_v15  ;;  %v821_v15 = vld [vmem:[#allocation5 + $0x68] sm:$0xff] }
 0x1f8   : > { %2109 = vmatprep.subr.bf16.mxu1 %v2068_v18 }
 0x1f9   : > { %v421_v40 = vpop.trf.xlu0 }
 0x1fa   : > { %1865 = vmatprep.mubr.msk.f32.mxu1 %vm431_vm0, %v421_v40 }
 0x1fb   : > { %2111 = vmatpush3.bf16.msra.mxu1 %v2068_v18  ;;  %v2521_v18 = vmov 0  }
 0x1fc   : > { %2113 = vmatprep.subr.bf16.mxu1 %v2072_v21  ;;  %2276 = vset.pattern.permute.xlu1 %v2521_v18 }
 0x1fd   : > { %v422_v41 = vpop.trf.xlu0  ;;  %2277 = vset.pattern.permute.xlu0 %v2521_v18 }
 0x1fe   : > { %1866 = vmatmul.mubr.msk.f32.gmra.mrb[6].mxu1 %vm431_vm0, %v422_v41 }
 0x1ff   : > { %2115 = vmatpush3.bf16.msra.mxu1 %v2072_v21 }
 0x200   : > { %2117 = vmatprep.subr.bf16.mxu1 %v2076_v24 }
 0x201   : > { %v423_v42 = vpop.trf.xlu0 }
 0x202   : > { %1868 = vmatprep.mubr.msk.f32.mxu1 %vm431_vm0, %v423_v42 }
 0x203   : > { %2119 = vmatpush3.bf16.msra.mxu1 %v2076_v24 }
 0x205   : > { %v424_v43 = vpop.trf.xlu0 }
 0x206   : > { %1869 = vmatmul.mubr.msk.f32.gmra.mrb[8].mxu1 %vm431_vm0, %v424_v43 }
 0x209   : > { %v425_v44 = vpop.trf.xlu0 }
 0x20a   : > { %1871 = vmatprep.mubr.msk.f32.mxu1 %vm431_vm0, %v425_v44 }
 0x20d   : > { %v426_v45 = vpop.trf.xlu0 }
 0x20e   : > { %1872 = vmatmul.mubr.msk.f32.gmra.mrb[10].mxu1 %vm431_vm0, %v426_v45 }
 0x211   : > { %v427_v46 = vpop.trf.xlu0 }
 0x212   : > { %1874 = vmatprep.mubr.msk.f32.mxu1 %vm431_vm0, %v427_v46 }
 0x215   : > { %v428_v47 = vpop.trf.xlu0 }
 0x216   : > { %1875 = vmatmul.mubr.msk.f32.gmra.mrb[12].mxu1 %vm431_vm0, %v428_v47 }
 0x219   : > { %v429_v48 = vpop.trf.xlu0 }
 0x21a   : > { %1877 = vmatprep.mubr.msk.f32.mxu1 %vm431_vm0, %v429_v48 }
 0x21d   : > { %v430_v49 = vpop.trf.xlu0 }
 0x21e   : > { %1878 = vmatmul.mubr.msk.f32.gmra.mrb[14].mxu1 %vm431_vm0, %v430_v49 }
 0x21f   : > { %1912 = vmatprep.mubr.f32.mxu1 %v808_v0 }
 0x222   : > { %1913 = vmatmul.mubr.f32.vlgmr.msra.gmra.mrb[16].mxu1 %v809_v1 }
 0x223   : > { %1915 = vmatprep.mubr.f32.mxu1 %v810_v2 }
 0x226   : > { %1916 = vmatmul.mubr.f32.gmra.mrb[18].mxu1 %v811_v4 }
 0x227   : > { %1918 = vmatprep.mubr.f32.mxu1 %v812_v6 }
 0x22a   : > { %1919 = vmatmul.mubr.f32.gmra.mrb[20].mxu1 %v813_v7 }
 0x22b   : > { %1921 = vmatprep.mubr.f32.mxu1 %v814_v8 }
 0x22e   : > { %1922 = vmatmul.mubr.f32.gmra.mrb[22].mxu1 %v815_v9 }
 0x22f   : > { %1924 = vmatprep.mubr.f32.mxu1 %v816_v10 }
 0x232   : > { %1925 = vmatmul.mubr.f32.gmra.mrb[24].mxu1 %v817_v11 }
 0x233   : > { %1927 = vmatprep.mubr.f32.mxu1 %v818_v12 }
 0x236   : > { %1928 = vmatmul.mubr.f32.gmra.mrb[26].mxu1 %v819_v13 }
 0x237   : > { %1930 = vmatprep.mubr.f32.mxu1 %v820_v14 }
 0x23a   : > { %1931 = vmatmul.mubr.f32.gmra.mrb[28].mxu1 %v821_v15 }
 0x23b   : > { %1933 = vmatprep.mubr.f32.mxu1 %v822_v16 }
 0x23e   : > { %1934 = vmatmul.mubr.f32.gmra.mrb[30].mxu1 %v823_v17 }
 0x2b9   : > { %v2774_v50 = vpop.f32.mrb[0].mxu1 }
 0x2ba   : > { %627 = vmax.xlane.f32.xlu1 %v2774_v50  ;;  %v2777_v51 = vpop.f32.mrb[1].mxu1 }
 0x2be   : > { %625 = vmax.xlane.f32.xlu1 %v2777_v51 }
 0x2c1   : > { %v2780_v52 = vpop.f32.mrb[2].mxu1 }
 0x2c2   : > { %631 = vmax.xlane.f32.xlu1 %v2780_v52  ;;  %v2783_v53 = vpop.f32.mrb[3].mxu1 }
 0x2c6   : > { %629 = vmax.xlane.f32.xlu1 %v2783_v53 }
 0x2c9   : > { %v2786_v54 = vpop.f32.mrb[4].mxu1 }
 0x2ca   : > { %635 = vmax.xlane.f32.xlu1 %v2786_v54  ;;  %v2789_v55 = vpop.f32.mrb[5].mxu1 }
 0x2cb   : > { %633 = vmax.xlane.f32.xlu0 %v2789_v55 }
 0x2d1   : > { %v2792_v56 = vpop.f32.mrb[6].mxu1 }
 0x2d2   : > { %639 = vmax.xlane.f32.xlu1 %v2792_v56  ;;  %v2795_v57 = vpop.f32.mrb[7].mxu1 }
 0x2d6   : > { %637 = vmax.xlane.f32.xlu1 %v2795_v57 }
 0x2d9   : > { %v2798_v58 = vpop.f32.mrb[8].mxu1 }
 0x2da   : > { %643 = vmax.xlane.f32.xlu1 %v2798_v58  ;;  %v2801_v59 = vpop.f32.mrb[9].mxu1 }
 0x2de   : > { %641 = vmax.xlane.f32.xlu1 %v2801_v59 }
 0x2e1   : > { %v2804_v60 = vpop.f32.mrb[10].mxu1 }
 0x2e2   : > { %647 = vmax.xlane.f32.xlu1 %v2804_v60  ;;  %v2807_v61 = vpop.f32.mrb[11].mxu1 }
 0x2e6   : > { %645 = vmax.xlane.f32.xlu1 %v2807_v61 }
 0x2e9   : > { %v2810_v62 = vpop.f32.mrb[12].mxu1 }
 0x2ea   : > { %651 = vmax.xlane.f32.xlu1 %v2810_v62  ;;  %v2813_v63 = vpop.f32.mrb[13].mxu1 }
 0x2ee   : > { %649 = vmax.xlane.f32.xlu1 %v2813_v63 }
 0x2f1   : > { %v2816_v3 = vpop.f32.mrb[14].mxu1 }
 0x2f2   : > { %v2818_v5 = vpop.f32.mrb[15].mxu1 }
 0x2f3   : > { %653 = vmax.xlane.f32.xlu1 %v2818_v5 }
 0x2f7   : > { %655 = vmax.xlane.f32.xlu1 %v2816_v3 }
 0x347   : > { %v628_v19 = vpop.xlane.xlu1 %627 }
 0x348   : > { %v658_v20 = vsub.f32 %v2774_v50, %v628_v19 }
 0x34a   : > { %v675_v21 = vmul.f32 1.442695, %v658_v20  ;;  %v826_v20 = vld [vmem:[%s3234_s3 + $0x10] sm:$0xff] }
 0x34b   : > { %v626_v22 = vpop.xlane.xlu1 %625 }
 0x34c   : > { %2278 = vpow2.f32 %v675_v21  ;;  %v657_v23 = vsub.f32 %v2777_v51, %v626_v22  ;;  %v827_v21 = vld [vmem:[%s3234_s3 + $0x18] sm:$0xff]  ;;  %v825_v22 = vld [vmem:[%s3234_s3 + $0x8] sm:$0xff] }
 0x34e   : > { %v673_v24 = vmul.f32 1.442695, %v657_v23  ;;  %v828_v23 = vld [vmem:[%s3234_s3 + $0x20] sm:$0xff] }
 0x34f   : > { %v632_v25 = vpop.xlane.xlu1 %631 }
 0x350   : > { %2280 = vpow2.f32 %v673_v24  ;;  %v660_v26 = vsub.f32 %v2780_v52, %v632_v25  ;;  %v833_v24 = vld [vmem:[%s3234_s3 + $0x48] sm:$0xff] }
 0x351   : > { %v829_v25 = vld [vmem:[%s3234_s3 + $0x28] sm:$0xff] }
 0x352   : > { %v679_v27 = vmul.f32 1.442695, %v660_v26  ;;  %v835_v26 = vld [vmem:[%s3234_s3 + $0x58] sm:$0xff] }
 0x353   : > { %v630_v28 = vpop.xlane.xlu1 %629 }
 0x354   : > { %2282 = vpow2.f32 %v679_v27  ;;  %v659_v29 = vsub.f32 %v2783_v53, %v630_v28  ;;  %v830_v27 = vld [vmem:[%s3234_s3 + $0x30] sm:$0xff]  ;;  %v837_v28 = vld [vmem:[%s3234_s3 + $0x68] sm:$0xff] }
 0x356   : > { %v2826_v30 = vpop.eup %2278  ;;  %v677_v31 = vmul.f32 1.442695, %v659_v29  ;;  %v831_v29 = vld [vmem:[%s3234_s3 + $0x38] sm:$0xff] }
 0x357   : > { %v636_v32 = vpop.xlane.xlu1 %635  ;;  %707 = vadd.xlane.f32.xlu1 %v2826_v30 }
 0x358   : > { %2284 = vpow2.f32 %v677_v31  ;;  %v662_v33 = vsub.f32 %v2786_v54, %v636_v32  ;;  %v634_v34 = vpop.xlane.xlu0 %633  ;;  %v839_v31 = vld [vmem:[%s3234_s3 + $0x78] sm:$0xff]  ;;  %v832_v32 = vld [vmem:[%s3234_s3 + $0x40] sm:$0xff] }
 0x359   : > { %v661_v35 = vsub.f32 %v2789_v55, %v634_v34  ;;  %v834_v34 = vld [vmem:[%s3234_s3 + $0x50] sm:$0xff] }
 0x35a   : > { %v2831_v36 = vpop.eup %2280  ;;  %v683_v37 = vmul.f32 1.442695, %v662_v33  ;;  %v1243_v33 = vld [vmem:[%s3236_s5 + $0x8] sm:$0xff] }
 0x35b   : > { %705 = vadd.xlane.f32.xlu1 %v2831_v36  ;;  %v681_v38 = vmul.f32 1.442695, %v661_v35  ;;  %v1245_v35 = vld [vmem:[%s3236_s5 + $0x18] sm:$0xff] }
 0x35c   : > { %2286 = vpow2.f32 %v683_v37  ;;  %v836_v37 = vld [vmem:[%s3234_s3 + $0x60] sm:$0xff] }
 0x35d   : > { %2288 = vpow2.f32 %v681_v38  ;;  %v1247_v38 = vld [vmem:[%s3236_s5 + $0x28] sm:$0xff] }
 0x35e   : > { %v2834_v39 = vpop.eup %2282 }
 0x35f   : > { %v640_v40 = vpop.xlane.xlu1 %639  ;;  %711 = vadd.xlane.f32.xlu1 %v2834_v39 }
 0x360   : > { %v664_v41 = vsub.f32 %v2792_v56, %v640_v40  ;;  %v838_v40 = vld [vmem:[%s3234_s3 + $0x70] sm:$0xff] }
 0x362   : > { %v2838_v42 = vpop.eup %2284  ;;  %v687_v43 = vmul.f32 1.442695, %v664_v41  ;;  %v1249_v41 = vld [vmem:[%s3236_s5 + $0x38] sm:$0xff] }
 0x363   : > { %v638_v44 = vpop.xlane.xlu1 %637  ;;  %709 = vadd.xlane.f32.xlu1 %v2838_v42 }
 0x364   : > { %2290 = vpow2.f32 %v687_v43  ;;  %v663_v45 = vsub.f32 %v2795_v57, %v638_v44  ;;  %v1242_v43 = vld [vmem:[%s3236_s5] sm:$0xff]  ;;  %v1251_v44 = vld [vmem:[%s3236_s5 + $0x48] sm:$0xff] }
 0x366   : > { %v2842_v46 = vpop.eup %2286  ;;  %v685_v47 = vmul.f32 1.442695, %v663_v45  ;;  %v1244_v45 = vld [vmem:[%s3236_s5 + $0x10] sm:$0xff] }
 0x367   : > { %v644_v48 = vpop.xlane.xlu1 %643  ;;  %715 = vadd.xlane.f32.xlu1 %v2842_v46  ;;  %v2846_v50 = vpop.eup %2288 }
 0x368   : > { %2292 = vpow2.f32 %v685_v47  ;;  %v666_v49 = vsub.f32 %v2798_v58, %v644_v48  ;;  %v2955_v47 = vpop.f32.mrb[16].mxu1  ;;  %v1253_v48 = vld [vmem:[%s3236_s5 + $0x58] sm:$0xff] }
 0x36a   : > { %v691_v51 = vmul.f32 1.442695, %v666_v49  ;;  %v2960_v49 = vpop.f32.mrb[17].mxu1 }
 0x36b   : > { %v642_v52 = vpop.xlane.xlu1 %641  ;;  %713 = vadd.xlane.f32.xlu1 %v2846_v50 }
 0x36c   : > { %2294 = vpow2.f32 %v691_v51  ;;  %v665_v53 = vsub.f32 %v2801_v59, %v642_v52  ;;  %v2962_v51 = vpop.f32.mrb[18].mxu1  ;;  %v1246_v52 = vld [vmem:[%s3236_s5 + $0x20] sm:$0xff] }
 0x36e   : > { %v2850_v54 = vpop.eup %2290  ;;  %v689_v55 = vmul.f32 1.442695, %v665_v53  ;;  %v2967_v53 = vpop.f32.mrb[19].mxu1 }
 0x36f   : > { %v648_v56 = vpop.xlane.xlu1 %647  ;;  %719 = vadd.xlane.f32.xlu1 %v2850_v54 }
 0x370   : > { %2296 = vpow2.f32 %v689_v55  ;;  %v668_v57 = vsub.f32 %v2804_v60, %v648_v56  ;;  %v1255_v55 = vld [vmem:[%s3236_s5 + $0x68] sm:$0xff]  ;;  %v2972_v56 = vpop.f32.mrb[20].mxu1 }
 0x372   : > { %v2854_v0 = vpop.eup %2292  ;;  %v695_v58 = vmul.f32 1.442695, %v668_v57  ;;  %v2974_v57 = vpop.f32.mrb[21].mxu1 }
 0x373   : > { %v646_v1 = vpop.xlane.xlu1 %645  ;;  %717 = vadd.xlane.f32.xlu1 %v2854_v0 }
 0x374   : > { %2298 = vpow2.f32 %v695_v58  ;;  %v667_v2 = vsub.f32 %v2807_v61, %v646_v1  ;;  %v2976_v58 = vpop.f32.mrb[22].mxu1  ;;  %v1248_v1 = vld [vmem:[%s3236_s5 + $0x30] sm:$0xff] }
 0x376   : > { %v2858_v4 = vpop.eup %2294  ;;  %v693_v59 = vmul.f32 1.442695, %v667_v2  ;;  %v2981_v2 = vpop.f32.mrb[23].mxu1 }
 0x377   : > { %v652_v6 = vpop.xlane.xlu1 %651  ;;  %723 = vadd.xlane.f32.xlu1 %v2858_v4 }
 0x378   : > { %2300 = vpow2.f32 %v693_v59  ;;  %v670_v7 = vsub.f32 %v2810_v62, %v652_v6  ;;  %v1257_v59 = vld [vmem:[%s3236_s5 + $0x78] sm:$0xff]  ;;  %v2986_v6 = vpop.f32.mrb[24].mxu1 }
 0x37a   : > { %v2862_v8 = vpop.eup %2296  ;;  %v699_v60 = vmul.f32 1.442695, %v670_v7  ;;  %v2988_v7 = vpop.f32.mrb[25].mxu1 }
 0x37b   : > { %v650_v9 = vpop.xlane.xlu1 %649  ;;  %721 = vadd.xlane.f32.xlu1 %v2862_v8 }
 0x37c   : > { %2302 = vpow2.f32 %v699_v60  ;;  %v669_v10 = vsub.f32 %v2813_v63, %v650_v9  ;;  %v2990_v60 = vpop.f32.mrb[26].mxu1  ;;  %v1250_v9 = vld [vmem:[%s3236_s5 + $0x40] sm:$0xff] }
 0x37e   : > { %v2866_v11 = vpop.eup %2298  ;;  %v697_v61 = vmul.f32 1.442695, %v669_v10  ;;  %v2995_v10 = vpop.f32.mrb[27].mxu1 }
 0x37f   : > { %727 = vadd.xlane.f32.xlu1 %v2866_v11 }
 0x380   : > { %2304 = vpow2.f32 %v697_v61  ;;  %v654_v12 = vpop.xlane.xlu1 %653  ;;  %v2997_v61 = vpop.f32.mrb[28].mxu1 }
 0x381   : > { %v671_v13 = vsub.f32 %v2818_v5, %v654_v12  ;;  %v2999_v12 = vpop.f32.mrb[29].mxu1 }
 0x382   : > { %v2870_v14 = vpop.eup %2300 }
 0x383   : > { %v701_v62 = vmul.f32 1.442695, %v671_v13  ;;  %725 = vadd.xlane.f32.xlu1 %v2870_v14  ;;  %v3001_v13 = vpop.f32.mrb[30].mxu1 }
 0x384   : > { %v656_v15 = vpop.xlane.xlu1 %655 }
 0x385   : > { %2306 = vpow2.f32 %v701_v62  ;;  %v672_v16 = vsub.f32 %v2816_v3, %v656_v15  ;;  %v824_v3 = vld [vmem:[%s3234_s3] sm:$0xff]  ;;  %v1252_v62 = vld [vmem:[%s3236_s5 + $0x50] sm:$0xff]  ;;  %v3006_v15 = vpop.f32.mrb[31].mxu1 }
 0x386   : > { %v2874_v17 = vpop.eup %2302 }
 0x387   : > { %v703_v63 = vmul.f32 1.442695, %v672_v16  ;;  %731 = vadd.xlane.f32.xlu0 %v2874_v17  ;;  %v1254_v16 = vld [vmem:[%s3236_s5 + $0x60] sm:$0xff] }
 0x389   : > { %2308 = vpow2.f32 %v703_v63 }
 0x38a   : > { %v2877_v18 = vpop.eup %2304 }
 0x38b   : > { %729 = vadd.xlane.f32.xlu1 %v2877_v18 }
 0x38f   : > { %v2880_v5 = vpop.eup %2306 }
 0x390   : > { %733 = vadd.xlane.f32.xlu1 %v2880_v5 }
 0x393   : > { %v2883_v19 = vpop.eup %2308 }
 0x394   : > { %735 = vadd.xlane.f32.xlu0 %v2883_v19 }
 0x3a1   : > { %842 = vperm.xlu1 %2276, %v824_v3   ;;  %v1256_v3 = vld [vmem:[%s3236_s5 + $0x70] sm:$0xff] }
 0x3a5   : > { %852 = vperm.xlu1 %2276, %v826_v20  }
 0x3a9   : > { %857 = vperm.xlu1 %2276, %v827_v21  }
 0x3aa   : > { %847 = vperm.xlu0 %2277, %v825_v22  }
 0x3ad   : > { %862 = vperm.xlu1 %2276, %v828_v23  }
 0x3ae   : > { %887 = vperm.xlu0 %2277, %v833_v24  }
 0x3b1   : > { %867 = vperm.xlu1 %2276, %v829_v25  }
 0x3b2   : > { %897 = vperm.xlu0 %2277, %v835_v26  }
 0x3b5   : > { %872 = vperm.xlu1 %2276, %v830_v27  }
 0x3b6   : > { %907 = vperm.xlu0 %2277, %v837_v28  }
 0x3b9   : > { %877 = vperm.xlu1 %2276, %v831_v29  }
 0x3ba   : > { %917 = vperm.xlu0 %2277, %v839_v31  }
 0x3bd   : > { %882 = vperm.xlu1 %2276, %v832_v32  }
 0x3be   : > { %1265 = vperm.xlu0 %2277, %v1243_v33  }
 0x3c1   : > { %892 = vperm.xlu1 %2276, %v834_v34  }
 0x3c2   : > { %1275 = vperm.xlu0 %2277, %v1245_v35  }
 0x3c5   : > { %902 = vperm.xlu1 %2276, %v836_v37  }
 0x3c6   : > { %1285 = vperm.xlu0 %2277, %v1247_v38  }
 0x3c9   : > { %912 = vperm.xlu1 %2276, %v838_v40  }
 0x3ca   : > { %1295 = vperm.xlu0 %2277, %v1249_v41  }
 0x3cd   : > { %1260 = vperm.xlu1 %2276, %v1242_v43  }
 0x3ce   : > { %1305 = vperm.xlu0 %2277, %v1251_v44  }
 0x3d1   : > { %1270 = vperm.xlu1 %2276, %v1244_v45  }
 0x3d2   : > { %1315 = vperm.xlu0 %2277, %v1253_v48  }
 0x3d5   : > { %1280 = vperm.xlu1 %2276, %v1246_v52  }
 0x3d6   : > { %1325 = vperm.xlu0 %2277, %v1255_v55  }
 0x3d9   : > { %1290 = vperm.xlu1 %2276, %v1248_v1  }
 0x3da   : > { %1335 = vperm.xlu0 %2277, %v1257_v59  }
 0x3dd   : > { %1300 = vperm.xlu1 %2276, %v1250_v9  }
 0x3e1   : > { %1310 = vperm.xlu1 %2276, %v1252_v62  }
 0x3e4   : > { %v708_v63 = vpop.xlane.xlu1 %707 }
 0x3e5   : > { %1320 = vperm.xlu1 %2276, %v1254_v16  }
 0x3e8   : > { %v706_v20 = vpop.xlane.xlu1 %705 }
 0x3e9   : > { %1330 = vperm.xlu1 %2276, %v1256_v3   ;;  %2310 = vrcp.f32 %v706_v20 }
 0x3ea   : > { %2312 = vrcp.f32 %v708_v63 }
 0x3ec   : > { %v712_v21 = vpop.xlane.xlu1 %711 }
 0x3f0   : > { %v710_v22 = vpop.xlane.xlu1 %709 }
 0x3f1   : > { %2314 = vrcp.f32 %v710_v22 }
 0x3f2   : > { %2316 = vrcp.f32 %v712_v21 }
 0x3f3   : > { %v2311_v26 = vpop.eup %2310 }
 0x3f4   : > { %v716_v23 = vpop.xlane.xlu1 %715  ;;  %v2313_v27 = vpop.eup %2312  ;;  %v3015_v31 = vmul.f32 %v2311_v26, %v2831_v36 }
 0x3f5   : > { %v3021_v34 = vmul.f32 %v2313_v27, %v2826_v30 }
 0x3f7   : > { %v769_v37 = vadd.f32 %v3021_v34, %v3015_v31 }
 0x3f8   : > { %v714_v24 = vpop.xlane.xlu1 %713 }
 0x3f9   : > { %2318 = vrcp.f32 %v714_v24 }
 0x3fa   : > { %2320 = vrcp.f32 %v716_v23 }
 0x3fb   : > { %v2315_v29 = vpop.eup %2314 }
 0x3fc   : > { %v720_v25 = vpop.xlane.xlu1 %719  ;;  %v3018_v32 = vmul.f32 %v2315_v29, %v2838_v42  ;;  %v2317_v35 = vpop.eup %2316 }
 0x3fd   : > { %v3027_v36 = vmul.f32 %v2317_v35, %v2834_v39 }
 0x3fe   : > { %v770_v41 = vadd.f32 %v769_v37, %v3018_v32 }
 0x400   : > { %v718_v28 = vpop.xlane.xlu1 %717  ;;  %v771_v30 = vadd.f32 %v770_v41, %v3027_v36 }
 0x401   : > { %2322 = vrcp.f32 %v718_v28 }
 0x402   : > { %2324 = vrcp.f32 %v720_v25 }
 0x403   : > { %v2319_v38 = vpop.eup %2318 }
 0x404   : > { %v724_v33 = vpop.xlane.xlu1 %723  ;;  %v3030_v42 = vmul.f32 %v2319_v38, %v2846_v50  ;;  %v2321_v43 = vpop.eup %2320 }
 0x405   : > { %v3035_v52 = vmul.f32 %v2321_v43, %v2842_v46 }
 0x406   : > { %v772_v48 = vadd.f32 %v771_v30, %v3030_v42 }
 0x408   : > { %v722_v40 = vpop.xlane.xlu1 %721  ;;  %v773_v50 = vadd.f32 %v772_v48, %v3035_v52 }
 0x409   : > { %2326 = vrcp.f32 %v722_v40 }
 0x40a   : > { %2328 = vrcp.f32 %v724_v33 }
 0x40b   : > { %v2323_v45 = vpop.eup %2322 }
 0x40c   : > { %v728_v44 = vpop.xlane.xlu1 %727  ;;  %v3038_v55 = vmul.f32 %v2323_v45, %v2854_v0  ;;  %v2325_v39 = vpop.eup %2324 }
 0x40d   : > { %v752_v62 = vmul.f32 %v2325_v39, %v2850_v54 }
 0x40e   : > { %v774_v9 = vadd.f32 %v773_v50, %v3038_v55 }
 0x410   : > { %v726_v1 = vpop.xlane.xlu1 %725  ;;  %v775_v3 = vadd.f32 %v774_v9, %v752_v62 }
 0x411   : > { %2330 = vrcp.f32 %v726_v1 }
 0x412   : > { %2332 = vrcp.f32 %v728_v44 }
 0x413   : > { %v2327_v59 = vpop.eup %2326 }
 0x414   : > { %v3044_v16 = vmul.f32 %v2327_v59, %v2862_v8  ;;  %v732_v63 = vpop.xlane.xlu0 %731  ;;  %v2329_v20 = vpop.eup %2328 }
 0x415   : > { %v756_v22 = vmul.f32 %v2329_v20, %v2858_v4 }
 0x416   : > { %v776_v0 = vadd.f32 %v775_v3, %v3044_v16 }
 0x418   : > { %v730_v46 = vpop.xlane.xlu1 %729  ;;  %v777_v25 = vadd.f32 %v776_v0, %v756_v22 }
 0x419   : > { %2334 = vrcp.f32 %v730_v46 }
 0x41a   : > { %2336 = vrcp.f32 %v732_v63 }
 0x41b   : > { %v2331_v21 = vpop.eup %2330 }
 0x41c   : > { %v758_v23 = vmul.f32 %v2331_v21, %v2870_v14  ;;  %v2333_v54 = vpop.eup %2332 }
 0x41d   : > { %v734_v24 = vpop.xlane.xlu1 %733  ;;  %v760_v28 = vmul.f32 %v2333_v54, %v2866_v11 }
 0x41e   : > { %2338 = vrcp.f32 %v734_v24  ;;  %v778_v26 = vadd.f32 %v777_v25, %v758_v23 }
 0x420   : > { %v779_v38 = vadd.f32 %v778_v26, %v760_v28 }
 0x421   : > { %v736_v8 = vpop.xlane.xlu0 %735  ;;  %v843_v27 = vpop.permute.xlu1 %842 }
 0x422   : > { %2340 = vrcp.f32 %v736_v8  ;;  %v987_v29 = vadd.f32 %v2960_v49, %v843_v27 }
 0x423   : > { %v2335_v33 = vpop.eup %2334 }
 0x424   : > { %v2337_v35 = vpop.eup %2336  ;;  %v762_v37 = vmul.f32 %v2335_v33, %v2877_v18  ;;  %1968 = vmatprep.mubr.f32.mxu0 %v987_v29 }
 0x425   : > { %v764_v14 = vmul.f32 %v2337_v35, %v2874_v17  ;;  %v853_v3 = vpop.permute.xlu1 %852 }
 0x426   : > { %v780_v4 = vadd.f32 %v779_v38, %v762_v37 }
 0x428   : > { %v2339_v40 = vpop.eup %2338  ;;  %v781_v43 = vadd.f32 %v780_v4, %v764_v14 }
 0x429   : > { %v766_v41 = vmul.f32 %v2339_v40, %v2880_v5  ;;  %v848_v4 = vpop.permute.xlu0 %847 }
 0x42b   : > { %v782_v11 = vadd.f32 %v781_v43, %v766_v41 }
 0x42c   : > { %v2341_v44 = vpop.eup %2340 }
 0x42d   : > { %v768_v30 = vmul.f32 %v2341_v44, %v2883_v19  ;;  %v888_v44 = vpop.permute.xlu0 %887 }
 0x42f   : > { %v783_v45 = vadd.f32 %v782_v11, %v768_v30 }
 0x431   : > { %v784_v48 = vrot.slane %v783_v45, 4 }
 0x433   : > { %v785_v49 = vadd.f32 %v784_v48, %v783_v45  ;;  %v898_v45 = vpop.permute.xlu0 %897 }
 0x435   : > { %v786_v1 = vrot.slane %v785_v49, 2 }
 0x437   : > { %v787_v39 = vadd.f32 %v786_v1, %v785_v49 }
 0x439   : > { %v788_v50 = vrot.slane %v787_v39, 1 }
 0x43b   : > { %v789_v18 = vadd.f32 %v788_v50, %v787_v39  ;;  %v1228_v39 = vld [vmem:[#allocation7 + $0x10] sm:$0xff]  ;;  %v3079_v50 = vld [vmem:[%s2722_s15 + $0x8] sm:$0xff] }
 0x43c   : > { %2027 = vmatprep.mubr.f32.mxu1 %v1228_v39  ;;  %v1235_v39 = vld [vmem:[#allocation7 + $0x48] sm:$0xff] }
 0x43d   : > { %v790_v59 = vadd.f32 1e-09, %v789_v18 }
 0x43f   : > { %2342 = vrcp.f32 %v790_v59 }
 0x449   : > { %v2343_v9 = vpop.eup %2342 }
 0x44a   : > { %v792_v17 = vmul.f32 %v2343_v9, %v3015_v31  ;;  %v793_v63 = vmul.f32 %v2343_v9, %v3021_v34  ;;  %v794_v5 = vmul.f32 %v2343_v9, %v3018_v32  ;;  %v795_v46 = vmul.f32 %v2343_v9, %v3027_v36  ;;  %v858_v34 = vpop.permute.xlu1 %857 }
 0x44b   : > { %v796_v0 = vmul.f32 %v2343_v9, %v3030_v42  ;;  %v797_v21 = vmul.f32 %v2343_v9, %v3035_v52  ;;  %v798_v25 = vmul.f32 %v2343_v9, %v3038_v55  ;;  %v799_v31 = vmul.f32 %v2343_v9, %v752_v62 }
 0x44c   : > { %v2120_v19 = vpack.c.bf16 %v793_v63, %v792_v17  ;;  %v2124_v20 = vpack.c.bf16 %v795_v46, %v794_v5  ;;  %v800_v36 = vmul.f32 %v2343_v9, %v3044_v16  ;;  %v801_v54 = vmul.f32 %v2343_v9, %v756_v22  ;;  %v3087_v17 = vld [vmem:[%s2722_s15 + $0x18] sm:$0xff]  ;;  %v3091_v46 = vld [vmem:[%s2722_s15 + $0x10] sm:$0xff] }
 0x44d   : > { %v2128_v24 = vpack.c.bf16 %v797_v21, %v796_v0  ;;  %v2132_v32 = vpack.c.bf16 %v799_v31, %v798_v25  ;;  %v802_v42 = vmul.f32 %v2343_v9, %v758_v23  ;;  %v803_v27 = vmul.f32 %v2343_v9, %v760_v28  ;;  %v3095_v0 = vld [vmem:[%s2722_s15 + $0x28] sm:$0xff]  ;;  %v3099_v25 = vld [vmem:[%s2722_s15 + $0x20] sm:$0xff] }
 0x44e   : > { %2121 = vmatprep.subr.bf16.mxu0 %v2120_v19  ;;  %v863_v26 = vpop.permute.xlu1 %862  ;;  %v2136_v8 = vpack.c.bf16 %v801_v54, %v800_v36  ;;  %v804_v29 = vmul.f32 %v2343_v9, %v762_v37  ;;  %v805_v33 = vmul.f32 %v2343_v9, %v764_v14  ;;  %v806_v35 = vmul.f32 %v2343_v9, %v766_v41  ;;  %v3103_v36 = vld [vmem:[%s2722_s15 + $0x38] sm:$0xff] }
 0x44f   : > { %2123 = vmatpush3.bf16.msra.mxu0 %v2120_v19  ;;  %v2140_v52 = vpack.c.bf16 %v803_v27, %v802_v42  ;;  %v807_v38 = vmul.f32 %v2343_v9, %v768_v30  ;;  %v992_v28 = vadd.f32 %v2955_v47, %v848_v4  ;;  %v997_v37 = vadd.f32 %v2967_v53, %v853_v3 }
 0x450   : > { %2125 = vmatprep.subr.bf16.mxu0 %v2124_v20  ;;  %v2144_v62 = vpack.c.bf16 %v805_v33, %v804_v29  ;;  %v1002_v14 = vadd.f32 %v2962_v51, %v858_v34  ;;  %v1007_v40 = vadd.f32 %v2974_v57, %v863_v26  ;;  %v1032_v51 = vadd.f32 %v2986_v6, %v888_v44  ;;  %v3111_v29 = vld [vmem:[%s2722_s15 + $0x48] sm:$0xff] }
 0x451   : > { %v2148_v22 = vpack.c.bf16 %v807_v38, %v806_v35 }
 0x452   : > { %v868_v55 = vpop.permute.xlu1 %867 }
 0x453   : > { %2127 = vmatpush3.bf16.msra.mxu0 %v2124_v20  ;;  %v1012_v43 = vadd.f32 %v2972_v56, %v868_v55  ;;  %v1042_v56 = vadd.f32 %v2990_v60, %v898_v45  ;;  %v1226_v60 = vld [vmem:[#allocation7] sm:$0xff]  ;;  %v3135_v45 = vld [vmem:[%s2722_s15 + $0x78] sm:$0xff] }
 0x454   : > { %2129 = vmatprep.subr.bf16.mxu0 %v2128_v24 }
 0x456   : > { %v873_v16 = vpop.permute.xlu1 %872 }
 0x457   : > { %2131 = vmatpush3.bf16.msra.mxu0 %v2128_v24  ;;  %v1017_v30 = vadd.f32 %v2981_v2, %v873_v16  ;;  %v908_v2 = vpop.permute.xlu0 %907 }
 0x458   : > { %2133 = vmatprep.subr.bf16.mxu0 %v2132_v32 }
 0x45a   : > { %v878_v23 = vpop.permute.xlu1 %877 }
 0x45b   : > { %2135 = vmatpush3.bf16.msra.mxu0 %v2132_v32  ;;  %v1022_v47 = vadd.f32 %v2976_v58, %v878_v23  ;;  %v918_v6 = vpop.permute.xlu0 %917 }
 0x45c   : > { %2137 = vmatprep.subr.bf16.mxu0 %v2136_v8 }
 0x45e   : > { %v883_v41 = vpop.permute.xlu1 %882 }
 0x45f   : > { %2139 = vmatpush3.bf16.msra.mxu0 %v2136_v8  ;;  %v1027_v53 = vadd.f32 %v2988_v7, %v883_v41  ;;  %v1052_v7 = vadd.f32 %v2997_v61, %v908_v2  ;;  %v3107_v8 = vld [vmem:[%s2722_s15 + $0x30] sm:$0xff]  ;;  %v3127_v41 = vld [vmem:[%s2722_s15 + $0x68] sm:$0xff] }
 0x460   : > { %2141 = vmatprep.subr.bf16.mxu0 %v2140_v52 }
 0x462   : > { %v893_v11 = vpop.permute.xlu1 %892 }
 0x463   : > { %2143 = vmatpush3.bf16.msra.mxu0 %v2140_v52  ;;  %v1037_v57 = vadd.f32 %v2995_v10, %v893_v11  ;;  %v1062_v10 = vadd.f32 %v3001_v13, %v918_v6  ;;  %v1232_v6 = vld [vmem:[#allocation7 + $0x30] sm:$0xff] }
 0x464   : > { %2145 = vmatprep.subr.bf16.mxu0 %v2144_v62 }
 0x466   : > { %v903_v48 = vpop.permute.xlu1 %902 }
 0x467   : > { %2147 = vmatpush3.bf16.msra.mxu0 %v2144_v62  ;;  %v1047_v49 = vadd.f32 %v2999_v12, %v903_v48  ;;  %v3115_v62 = vld [vmem:[%s2722_s15 + $0x40] sm:$0xff]  ;;  %v3139_v48 = vld [vmem:[%s2722_s15 + $0x70] sm:$0xff] }
 0x468   : > { %2149 = vmatprep.subr.bf16.mxu0 %v2148_v22 }
 0x46a   : > { %v913_v58 = vpop.permute.xlu1 %912 }
 0x46b   : > { %2151 = vmatpush3.bf16.msra.mxu0 %v2148_v22  ;;  %v1057_v1 = vadd.f32 %v3006_v15, %v913_v58  ;;  %v3083_v15 = vld [vmem:[%s2722_s15] sm:$0xff]  ;;  %v3119_v22 = vld [vmem:[%s2722_s15 + $0x58] sm:$0xff] }
 0x46c   : > { %v1229_v58 = vld [vmem:[#allocation7 + $0x18] sm:$0xff] }
 0x46e   : > { %1969 = vmatmul.mubr.f32.vlgmr.msra.gmra.mrb[4].mxu0 %v992_v28  ;;  %v3123_v28 = vld [vmem:[%s2722_s15 + $0x50] sm:$0xff] }
 0x46f   : > { %1971 = vmatprep.mubr.f32.mxu0 %v997_v37 }
 0x472   : > { %1972 = vmatmul.mubr.f32.gmra.mrb[6].mxu0 %v1002_v14 }
 0x473   : > { %1974 = vmatprep.mubr.f32.mxu0 %v1007_v40 }
 0x476   : > { %1975 = vmatmul.mubr.f32.gmra.mrb[8].mxu0 %v1012_v43 }
 0x477   : > { %1977 = vmatprep.mubr.f32.mxu0 %v1017_v30  ;;  %v3131_v30 = vld [vmem:[%s2722_s15 + $0x60] sm:$0xff]  ;;  %s286_s15 = sand.u32 1, %s2506_s22  }
 0x478   : > { %s1648_s17 = sshll.u32 %s286_s15, 7  ;;  %s3190_s25 = scalar_lea.sflag [#allocation4], %s286_s15 }
 0x479   : > { %s3149_s30 = scalar_lea.vmem [#allocation8], %s1648_s17 }
 0x47a   : > { %1978 = vmatmul.mubr.f32.gmra.mrb[10].mxu0 %v1022_v47  ;;  %s1545_s19 = sshll.u32 %s3149_s30, 4  ;;  %s3183_s19 = int_to_ptr.vmem [resolvable:$true] %s1545_s19 }
 0x47b   : > { %1980 = vmatprep.mubr.f32.mxu0 %v1027_v53  ;;  %s2444_s10 = scalar_lea.vmem %s3183_s19, 2048  ;;  %p2451_p13 = scmp.lt.s32.totalorder %s3183_s19, %s2449_s11 }
 0x47c   : > { %p2445_p12 = scmp.ne.s32.totalorder %s3183_s19, %s2444_s10  ;;  %p2452_p1 = scmp.lt.s32.totalorder %s2450_s14, %s2444_s10 }
 0x47e   : > { %1981 = vmatmul.mubr.f32.gmra.mrb[12].mxu0 %v1032_v51  ;;  %p2446_p8 = pnand %p2445_p12, %p3254_p7  ;;  %p2453_p6 = por %p2452_p1, %p2451_p13 }
 0x47f   : > { %1983 = vmatprep.mubr.f32.mxu0 %v1037_v57 }
 0x480   : > { %p2447_p11 = pneg %p2446_p8 }
 0x482   : > { %1984 = vmatmul.mubr.f32.gmra.mrb[14].mxu0 %v1042_v56  ;;  %p2454_p9 = pnand %p2453_p6, %p2447_p11 }
 0x483   : > { %1986 = vmatprep.mubr.f32.mxu0 %v1047_v49  ;;  %v1227_v49 = vld [vmem:[#allocation7 + $0x8] sm:$0xff] }
 0x486   : > { %1987 = vmatmul.mubr.f32.gmra.mrb[16].mxu0 %v1052_v7  ;;  %v1230_v7 = vld [vmem:[#allocation7 + $0x20] sm:$0xff] }
 0x487   : > { %1989 = vmatprep.mubr.f32.mxu0 %v1057_v1  ;;  %v1231_v1 = vld [vmem:[#allocation7 + $0x28] sm:$0xff] }
 0x48a   : > { %1990 = vmatmul.mubr.f32.gmra.mrb[18].mxu0 %v1062_v10  ;;  %v1233_v10 = vld [vmem:[#allocation7 + $0x38] sm:$0xff] }
 0x48b   : > { %2024 = vmatprep.mubr.f32.mxu0 %v1226_v60  ;;  %v1234_v60 = vld [vmem:[#allocation7 + $0x40] sm:$0xff] }
 0x541   : > { %v1970_v12 = vpop.f32.mrb[4].mxu0 }
 0x542   : > { %v1211_v18 = vsub.f32 %v3079_v50, %v1970_v12  ;;  %v1131_v61 = vpop.f32.mrb[5].mxu0  ;;  %v1236_v12 = vld [vmem:[#allocation7 + $0x50] sm:$0xff] }
 0x543   : > { %v1210_v59 = vsub.f32 %v3083_v15, %v1131_v61  ;;  %v1238_v61 = vld [vmem:[#allocation7 + $0x60] sm:$0xff] }
 0x545   : > { %v2152_v9 = vpack.c.bf16 %v1211_v18, %v1210_v59  ;;  %v1973_v13 = vpop.f32.mrb[6].mxu0  ;;  %v1237_v18 = vld [vmem:[#allocation7 + $0x58] sm:$0xff]  ;;  %v1239_v59 = vld [vmem:[#allocation7 + $0x68] sm:$0xff] }
 0x546   : > { %v1213_v63 = vsub.f32 %v3087_v17, %v1973_v13  ;;  %v1141_v5 = vpop.f32.mrb[7].mxu0  ;;  %v1241_v13 = vld [vmem:[#allocation7 + $0x78] sm:$0xff] }
 0x547   : > { %v1212_v19 = vsub.f32 %v3091_v46, %v1141_v5  ;;  %2153 = vmatprep.subr.bf16.mxu0 %v2152_v9  ;;  %2184 = vmatprep.subr.bf16.mxu1 %v2152_v9  ;;  %v1266_v5 = vpop.permute.xlu0 %1265 }
 0x548   : > { %2155 = vmatpush3.bf16.msra.mxu0 %v2152_v9  ;;  %2192 = vmatpush3.bf16.msra.mxu1 %v2152_v9  ;;  %v1240_v9 = vld [vmem:[#allocation7 + $0x70] sm:$0xff] }
 0x549   : > { %v2156_v3 = vpack.c.bf16 %v1213_v63, %v1212_v19  ;;  %v1976_v20 = vpop.f32.mrb[8].mxu0  ;;  %v1261_v63 = vpop.permute.xlu1 %1260 }
 0x54a   : > { %v1215_v21 = vsub.f32 %v3095_v0, %v1976_v20  ;;  %v1151_v24 = vpop.f32.mrb[9].mxu0 }
 0x54b   : > { %v1214_v31 = vsub.f32 %v3099_v25, %v1151_v24  ;;  %2157 = vmatprep.subr.bf16.mxu0 %v2156_v3  ;;  %2185 = vmatprep.subr.bf16.mxu1 %v2156_v3 }
 0x54c   : > { %2159 = vmatpush3.bf16.msra.mxu0 %v2156_v3  ;;  %2193 = vmatpush3.bf16.msra.mxu1 %v2156_v3  ;;  %v1276_v3 = vpop.permute.xlu0 %1275 }
 0x54d   : > { %v2160_v34 = vpack.c.bf16 %v1215_v21, %v1214_v31  ;;  %v1979_v32 = vpop.f32.mrb[10].mxu0  ;;  %v1271_v19 = vpop.permute.xlu1 %1270 }
 0x54e   : > { %v1217_v54 = vsub.f32 %v3103_v36, %v1979_v32  ;;  %v1161_v26 = vpop.f32.mrb[11].mxu0 }
 0x54f   : > { %v1216_v42 = vsub.f32 %v3107_v8, %v1161_v26  ;;  %2161 = vmatprep.subr.bf16.mxu0 %v2160_v34  ;;  %2186 = vmatprep.subr.bf16.mxu1 %v2160_v34 }
 0x550   : > { %2163 = vmatpush3.bf16.msra.mxu0 %v2160_v34  ;;  %2194 = vmatpush3.bf16.msra.mxu1 %v2160_v34  ;;  %v1286_v21 = vpop.permute.xlu0 %1285 }
 0x551   : > { %v2164_v27 = vpack.c.bf16 %v1217_v54, %v1216_v42  ;;  %v1982_v52 = vpop.f32.mrb[12].mxu0  ;;  %v1281_v20 = vpop.permute.xlu1 %1280 }
 0x552   : > { %v1219_v33 = vsub.f32 %v3111_v29, %v1982_v52  ;;  %v1171_v55 = vpop.f32.mrb[13].mxu0 }
 0x553   : > { %v1218_v35 = vsub.f32 %v3115_v62, %v1171_v55  ;;  %2165 = vmatprep.subr.bf16.mxu0 %v2164_v27  ;;  %2187 = vmatprep.subr.bf16.mxu1 %v2164_v27 }
 0x554   : > { %2167 = vmatpush3.bf16.msra.mxu0 %v2164_v27  ;;  %2195 = vmatpush3.bf16.msra.mxu1 %v2164_v27  ;;  %v1296_v31 = vpop.permute.xlu0 %1295 }
 0x555   : > { %v2168_v38 = vpack.c.bf16 %v1219_v33, %v1218_v35  ;;  %v1985_v16 = vpop.f32.mrb[14].mxu0  ;;  %v1291_v24 = vpop.permute.xlu1 %1290 }
 0x556   : > { %v1221_v4 = vsub.f32 %v3119_v22, %v1985_v16  ;;  %v1181_v23 = vpop.f32.mrb[15].mxu0 }
 0x557   : > { %v1220_v37 = vsub.f32 %v3123_v28, %v1181_v23  ;;  %2169 = vmatprep.subr.bf16.mxu0 %v2168_v38  ;;  %2188 = vmatprep.subr.bf16.mxu1 %v2168_v38 }
 0x558   : > { %2171 = vmatpush3.bf16.msra.mxu0 %v2168_v38  ;;  %2196 = vmatpush3.bf16.msra.mxu1 %v2168_v38 }
 0x559   : > { %v2172_v14 = vpack.c.bf16 %v1221_v4, %v1220_v37  ;;  %v1988_v40 = vpop.f32.mrb[16].mxu0 }
 0x55a   : > { %v1223_v43 = vsub.f32 %v3127_v41, %v1988_v40  ;;  %v1191_v44 = vpop.f32.mrb[17].mxu0 }
 0x55b   : > { %v1222_v11 = vsub.f32 %v3131_v30, %v1191_v44  ;;  %2173 = vmatprep.subr.bf16.mxu0 %v2172_v14  ;;  %2189 = vmatprep.subr.bf16.mxu1 %v2172_v14 }
 0x55c   : > { %2175 = vmatpush3.bf16.msra.mxu0 %v2172_v14  ;;  %2197 = vmatpush3.bf16.msra.mxu1 %v2172_v14 }
 0x55d   : > { %v2176_v47 = vpack.c.bf16 %v1223_v43, %v1222_v11  ;;  %v1991_v53 = vpop.f32.mrb[18].mxu0  ;;  %v1306_v43 = vpop.permute.xlu0 %1305 }
 0x55e   : > { %v1225_v51 = vsub.f32 %v3135_v45, %v1991_v53  ;;  %v1201_v57 = vpop.f32.mrb[19].mxu0  ;;  %v1301_v53 = vpop.permute.xlu1 %1300 }
 0x55f   : > { %v1224_v56 = vsub.f32 %v3139_v48, %v1201_v57  ;;  %2177 = vmatprep.subr.bf16.mxu0 %v2176_v47  ;;  %2190 = vmatprep.subr.bf16.mxu1 %v2176_v47 }
 0x560   : > { %2179 = vmatpush3.bf16.msra.mxu0 %v2176_v47  ;;  %2198 = vmatpush3.bf16.msra.mxu1 %v2176_v47 }
 0x561   : > { %v2180_v2 = vpack.c.bf16 %v1225_v51, %v1224_v56 }
 0x563   : > { %2181 = vmatprep.subr.bf16.mxu0 %v2180_v2  ;;  %2191 = vmatprep.subr.bf16.mxu1 %v2180_v2 }
 0x564   : > { %2183 = vmatpush3.bf16.msra.mxu0 %v2180_v2  ;;  %2199 = vmatpush3.bf16.msra.mxu1 %v2180_v2 }
 0x567   : > { %2025 = vmatmul.mubr.f32.vlgmr.msra.gmra.mrb[20].mxu0 %v1227_v49  ;;  %2028 = vmatmul.mubr.f32.vlgmr.msra.gmra.mrb[32].mxu1 %v1229_v58  ;;  %v1316_v58 = vpop.permute.xlu0 %1315 }
 0x568   : > { %2030 = vmatprep.mubr.f32.mxu1 %v1230_v7 }
 0x56b   : > { %2031 = vmatmul.mubr.f32.gmra.mrb[34].mxu1 %v1231_v1 }
 0x56c   : > { %2033 = vmatprep.mubr.f32.mxu1 %v1232_v6  ;;  %v1311_v6 = vpop.permute.xlu1 %1310 }
 0x56f   : > { %2034 = vmatmul.mubr.f32.gmra.mrb[36].mxu1 %v1233_v10 }
 0x570   : > { %2036 = vmatprep.mubr.f32.mxu1 %v1234_v60 }
 0x573   : > { %2037 = vmatmul.mubr.f32.gmra.mrb[38].mxu1 %v1235_v39 }
 0x574   : > { %2039 = vmatprep.mubr.f32.mxu1 %v1236_v12 }
 0x577   : > { %2040 = vmatmul.mubr.f32.gmra.mrb[40].mxu1 %v1237_v18 }
 0x578   : > { %2042 = vmatprep.mubr.f32.mxu1 %v1238_v61 }
 0x57b   : > { %2043 = vmatmul.mubr.f32.gmra.mrb[42].mxu1 %v1239_v59 }
 0x57c   : > { %2045 = vmatprep.mubr.f32.mxu1 %v1240_v9 }
 0x57f   : > { %2046 = vmatmul.mubr.f32.gmra.mrb[44].mxu1 %v1241_v13 }
 0x63a   : > { %v2026_v34 = vpop.f32.mrb[20].mxu0  ;;  %v2029_v32 = vpop.f32.mrb[32].mxu1 }
 0x63b   : > { %v1410_v54 = vadd.f32 %v2026_v34, %v1266_v5  ;;  %v1420_v26 = vadd.f32 %v2029_v32, %v1276_v3  ;;  %v1404_v42 = vpop.f32.mrb[21].mxu0  ;;  %v1414_v27 = vpop.f32.mrb[33].mxu1 }
 0x63c   : > { %v1405_v52 = vadd.f32 %v1404_v42, %v1261_v63  ;;  %v1415_v33 = vadd.f32 %v1414_v27, %v1271_v19  ;;  %v1326_v63 = vpop.permute.xlu0 %1325  ;;  %v1321_v19 = vpop.permute.xlu1 %1320 }
 0x63d   : > { %v1484_v55 = vmax.f32 %v1410_v54, 0.0  ;;  %v1486_v35 = vmax.f32 %v1420_v26, 0.0 }
 0x63e   : > { %v1483_v38 = vmax.f32 %v1405_v52, 0.0  ;;  %v1485_v16 = vmax.f32 %v1415_v33, 0.0  ;;  %v2032_v4 = vpop.f32.mrb[34].mxu1 }
 0x63f   : > { %v1500_v23 = vadd.f32 %v3079_v50, %v1484_v55  ;;  %v1502_v37 = vadd.f32 %v3087_v17, %v1486_v35  ;;  %v1430_v14 = vadd.f32 %v2032_v4, %v1286_v21  ;;  %v1424_v40 = vpop.f32.mrb[35].mxu1 }
 0x640   : > { %v1499_v44 = vadd.f32 %v3083_v15, %v1483_v38  ;;  %v1501_v11 = vadd.f32 %v3091_v46, %v1485_v16  ;;  %v1425_v47 = vadd.f32 %v1424_v40, %v1281_v20  ;;  %v1336_v32 = vpop.permute.xlu0 %1335  ;;  %v1331_v42 = vpop.permute.xlu1 %1330 }
 0x641   : > { %1516 = vst [vmem:[%s3149_s30 + $0x8] sm:$0xff] %v1500_v23  ;;  %1518 = vst [vmem:[%s3149_s30 + $0x18] sm:$0xff] %v1502_v37  ;;  %v1488_v50 = vmax.f32 %v1430_v14, 0.0 }
 0x642   : > { %1515 = vst [vmem:[%s3149_s30] sm:$0xff] %v1499_v44  ;;  %1517 = vst [vmem:[%s3149_s30 + $0x10] sm:$0xff] %v1501_v11  ;;  %v1487_v17 = vmax.f32 %v1425_v47, 0.0  ;;  %v2035_v51 = vpop.f32.mrb[36].mxu1 }
 0x643   : > { %v1504_v15 = vadd.f32 %v3095_v0, %v1488_v50  ;;  %v1440_v46 = vadd.f32 %v2035_v51, %v1296_v31  ;;  %v1434_v57 = vpop.f32.mrb[37].mxu1 }
 0x644   : > { %v1503_v56 = vadd.f32 %v3099_v25, %v1487_v17  ;;  %v1435_v2 = vadd.f32 %v1434_v57, %v1291_v24 }
 0x645   : > { %1520 = vst [vmem:[%s3149_s30 + $0x28] sm:$0xff] %v1504_v15  ;;  %v1490_v49 = vmax.f32 %v1440_v46, 0.0 }
 0x646   : > { %1519 = vst [vmem:[%s3149_s30 + $0x20] sm:$0xff] %v1503_v56  ;;  %v1489_v7 = vmax.f32 %v1435_v2, 0.0  ;;  %v2038_v1 = vpop.f32.mrb[38].mxu1 }
 0x647   : > { %v1506_v10 = vadd.f32 %v3103_v36, %v1490_v49  ;;  %v1450_v60 = vadd.f32 %v2038_v1, %v1306_v43  ;;  %v1444_v39 = vpop.f32.mrb[39].mxu1 }
 0x648   : > { %v1505_v0 = vadd.f32 %v3107_v8, %v1489_v7  ;;  %v1445_v12 = vadd.f32 %v1444_v39, %v1301_v53 }
 0x649   : > { %1522 = vst [vmem:[%s3149_s30 + $0x38] sm:$0xff] %v1506_v10  ;;  %v1492_v25 = vmax.f32 %v1450_v60, 0.0 }
 0x64a   : > { %1521 = vst [vmem:[%s3149_s30 + $0x30] sm:$0xff] %v1505_v0  ;;  %v1491_v18 = vmax.f32 %v1445_v12, 0.0  ;;  %v2041_v61 = vpop.f32.mrb[40].mxu1 }
 0x64b   : > { %v1508_v59 = vadd.f32 %v3111_v29, %v1492_v25  ;;  %v1460_v9 = vadd.f32 %v2041_v61, %v1316_v58  ;;  %v1454_v13 = vpop.f32.mrb[41].mxu1 }
 0x64c   : > { %v1507_v36 = vadd.f32 %v3115_v62, %v1491_v18  ;;  %v1455_v5 = vadd.f32 %v1454_v13, %v1311_v6 }
 0x64d   : > { %1524 = vst [vmem:[%s3149_s30 + $0x48] sm:$0xff] %v1508_v59  ;;  %v1494_v8 = vmax.f32 %v1460_v9, 0.0 }
 0x64e   : > { %1523 = vst [vmem:[%s3149_s30 + $0x40] sm:$0xff] %v1507_v36  ;;  %v1493_v3 = vmax.f32 %v1455_v5, 0.0  ;;  %v2044_v20 = vpop.f32.mrb[42].mxu1 }
 0x64f   : > { %v1510_v21 = vadd.f32 %v3119_v22, %v1494_v8  ;;  %v1470_v24 = vadd.f32 %v2044_v20, %v1326_v63  ;;  %v1464_v31 = vpop.f32.mrb[43].mxu1 }
 0x650   : > { %v1509_v29 = vadd.f32 %v3123_v28, %v1493_v3  ;;  %v1465_v34 = vadd.f32 %v1464_v31, %v1321_v19 }
 0x651   : > { %1526 = vst [vmem:[%s3149_s30 + $0x58] sm:$0xff] %v1510_v21  ;;  %v1496_v62 = vmax.f32 %v1470_v24, 0.0 }
 0x652   : > { %1525 = vst [vmem:[%s3149_s30 + $0x50] sm:$0xff] %v1509_v29  ;;  %v1495_v54 = vmax.f32 %v1465_v34, 0.0  ;;  %v2047_v26 = vpop.f32.mrb[44].mxu1 }
 0x653   : > { %v1512_v27 = vadd.f32 %v3127_v41, %v1496_v62  ;;  %v1480_v22 = vadd.f32 %v2047_v26, %v1336_v32  ;;  %v1474_v52 = vpop.f32.mrb[45].mxu1 }
 0x654   : > { %v1511_v33 = vadd.f32 %v3131_v30, %v1495_v54  ;;  %v1475_v28 = vadd.f32 %v1474_v52, %v1331_v42 }
 0x655   : > { %1528 = vst [vmem:[%s3149_s30 + $0x68] sm:$0xff] %v1512_v27  ;;  %v1498_v55 = vmax.f32 %v1480_v22, 0.0 }
 0x656   : > { %1527 = vst [vmem:[%s3149_s30 + $0x60] sm:$0xff] %v1511_v33  ;;  %v1497_v35 = vmax.f32 %v1475_v28, 0.0 }
 0x657   : > { %v1514_v38 = vadd.f32 %v3135_v45, %v1498_v55 }
 0x658   : > { %v1513_v41 = vadd.f32 %v3139_v48, %v1497_v35 }
 0x659   : > { %1530 = vst [vmem:[%s3149_s30 + $0x78] sm:$0xff] %v1514_v38 }
 0x65a   : > { %1529 = vst [vmem:[%s3149_s30 + $0x70] sm:$0xff] %v1513_v41 }
 0x65b   : > { %2457 = shalt.err (!%p2454_p9)
}
 0x65c   : > { %s2458_s23 = scalar_lea.hbm %s3181_s29, 2048  ;;  %s2462_s28 = scalar_lea.hbm %s3237_s6, 4096 }
 0x65d   : > { %p2459_p2 = scmp.ne.s32.totalorder %s3181_s29, %s2458_s23  ;;  %p2463_p5 = scmp.lt.u32.totalorder %s3181_s29, %s3237_s6 }
 0x65e   : > { %p2464_p10 = scmp.lt.u32.totalorder %s2462_s28, %s2458_s23  ;;  %p2466_p12 = scmp.lt.u32.totalorder %s2458_s23, %s3181_s29 }
 0x65f   : > { %p2460_p0 = pnand %p2459_p2, %p3254_p7 }
 0x660   : > { %p2465_p4 = por %p2464_p10, %p2463_p5 }
 0x661   : > { %p2461_p3 = pneg %p2460_p0 }
 0x662   : > { %p2467_p8 = por %p2466_p12, %p2465_p4 }
 0x664   : > { %p2468_p11 = pnand %p2467_p8, %p2461_p3 }
 0x666   : > { %2471 = shalt.err (!%p2468_p11)
}
 0x667   : > { %s2523_s17 = smov 128   ;;  %s2524_s30 = smov 8  }
 0x668   : > { %2212 = dma.vmem_to_hbm [thread:$0]  (%p3254_p7), %s3183_s19, 2048, %s3181_s29, %s3190_s25, %s2523_s17, %s2523_s17, %s2524_s30  }
 0x669 PF: > { %p2234_p13 = scmp.ge.s32.totalorder %s2514_s24, 2  ;;  %s1560_s18 = sand.u32 1, %s2502_s21  }
 0x66a   : > { %p3255_p1 = scmp.ne.s32.totalorder %s3245_s8, 0  ;;  %s1561_s20 = scalar_lea.sflag [#allocation4], %s1560_s18 }
 0x66c   : > { %p2225_p6 = pnand %p2234_p13, %p3255_p1 }
 0x66e   : > { %2497 = dma.done.wait (!%p2225_p6), %s1561_s20, 2048  }
 0x66f   : > { %2499 = vsyncadd (!%p2225_p6), %s1561_s20, 4294965248  ;;  %s3256_s26 = sld [smem:[#allocation12_spill]]  ;;  %s3257_s23 = sld [smem:[#allocation13_spill]] }
 0x670   : > { %p18_p9 = scmp.ge.s32.totalorder %s2585_s27, 4   ;;  %s3258_s21 = smov %s2506_s22 }
 0x671   : > { %s3260_s24 = smov %s2585_s27 }
 0x672   :  { %20 = sbr.rel (!%p18_p9) target bundleno = 5 (0x5), region = 92 }
 0x675   : > { %s3259_s22 = smov %s3256_s26 }
 0x679   :  { %1566 = vsyncpa [#allocation3], 1 }
 0x67a   :  { %1568 = vsyncpa [#allocation3 + $0x1], 1 }
 0x67b   :  { %1569 = vsyncpa [#allocation6], 1 }
 0x67c   :  { %1570 = vsyncpa [#allocation4], 1 }
 0x67d   :  { %1572 = vsyncpa [#allocation4 + $0x1], 1 }

</bundles_post_ra>
